<compile_context>
chip_gen: v5e
topology: v5e:2x2
jax: 0.10.0
libtpu: 0.0.40
codegen_flags: <defaults>
</compile_context>

<pallas_src>
import functools

import jax
import jax.numpy as jnp
from jax.experimental import pallas as pl
from jax.experimental.pallas import tpu as pltpu


FEATURE_DIM = 512
LANE = 128


def _round_up(a: int, b: int) -> int:
    return ((a + b - 1) // b) * b


def _pick_tm(batch: int, tm_max: int):
    """Pad the batch to a multiple of 8 and pick the largest tile <= tm_max
    that divides it (avoids padding B=130 up to 256 rows)."""
    bp = _round_up(max(batch, 1), 8)
    for tm in (256, 128, 64, 32, 16, 8):
        if tm <= tm_max and bp % tm == 0:
            return tm, bp
    return 8, bp  # bp is always a multiple of 8


def _clip_fused_kernel(x_ref, w_enc_ref, w_fc_ref, b_ref, out_ref, acc_ref):
    """K-tiled encoder matmul + fused classification head.

    grid = (num_k, num_m): K (reduction) outer, batch-block inner, so each
    w_enc K-tile is fetched from HBM exactly once.

    x_ref     : [tm, tk]          bf16  flattened image tile
    w_enc_ref : [tk, 512]         bf16  frozen encoder weight tile
    w_fc_ref  : [512, Np]         bf16  head weight (lane-padded)
    b_ref     : [1, Np]           f32   folded bias (b_enc @ W_fc^T + b_fc)
    out_ref   : [tm, Np]          f32   lane-padded logits
    acc_ref   : [num_m, tm, 512]  f32   per-m-block feature accumulators
    """
    k = pl.program_id(0)
    m = pl.program_id(1)

    @pl.when(k == 0)
    def _():
        acc_ref[m] = jnp.zeros(acc_ref.shape[1:], acc_ref.dtype)

    # Pure bf16 MXU accumulate into the f32 per-m accumulator.
    acc_ref[m] = acc_ref[m] + jnp.dot(
        x_ref[...], w_enc_ref[...], preferred_element_type=jnp.float32)

    @pl.when(k == pl.num_programs(0) - 1)
    def _():
        feats = acc_ref[m].astype(jnp.bfloat16)      # explicit bf16 head matmul
        logits = jnp.dot(feats, w_fc_ref[...],
                         preferred_element_type=jnp.float32) + b_ref[...]
        out_ref[...] = logits.astype(out_ref.dtype)


def _forward_impl(image, w_enc, w_fc, b_comb, *, tm_max, tk, num_classes):
    """Jitted fused forward. image: [B, C, H, W] -> logits [B, num_classes]."""
    B = image.shape[0]
    # image.to(torch.float32); flatten; stream activations as bf16.
    x = image.astype(jnp.float32).reshape(B, -1).astype(jnp.bfloat16)
    K = x.shape[1]
    Kp, feat = w_enc.shape
    Np = w_fc.shape[1]

    tm, Bp = _pick_tm(B, tm_max)
    if (Bp, Kp) != (B, K):
        x = jnp.pad(x, ((0, Bp - B), (0, Kp - K)))   # pad in bf16 (half bytes)

    num_m = Bp // tm
    num_k = Kp // tk

    out = pl.pallas_call(
        _clip_fused_kernel,
        out_shape=jax.ShapeDtypeStruct((Bp, Np), jnp.float32),
        grid_spec=pltpu.PrefetchScalarGridSpec(
            num_scalar_prefetch=0,
            grid=(num_k, num_m),
            in_specs=[
                pl.BlockSpec((tm, tk), lambda k, m: (m, k)),      # x (bf16)
                pl.BlockSpec((tk, feat), lambda k, m: (k, 0)),    # w_enc (bf16)
                pl.BlockSpec((feat, Np), lambda k, m: (0, 0)),    # w_fc (bf16)
                pl.BlockSpec((1, Np), lambda k, m: (0, 0)),       # folded bias
            ],
            out_specs=pl.BlockSpec((tm, Np), lambda k, m: (m, 0)),
            scratch_shapes=[pltpu.VMEM((num_m, tm, feat), jnp.float32)],
        ),
        compiler_params=pltpu.CompilerParams(
            dimension_semantics=("arbitrary", "arbitrary"),
            vmem_limit_bytes=32 * 1024 * 1024,
        ),
    )(x, w_enc, w_fc, b_comb)

    return out[:B, :num_classes]


class CLIPClassifierPallas:
    """Mirrors CLIPClassifier.forward:
        features = clip_model.encode_image(image.float()).float()   # frozen
        logits   = fc(features)                                     # Linear(512, nc)
    """

    def __init__(self, input_shape, num_classes, key, *, tk_max=4096, tm_max=256):
        C, H, W = input_shape
        in_dim = C * H * W
        self.in_dim = in_dim
        self.num_classes = num_classes

        # K tile: multiple of 128, capped at tk_max; Kp divisible by tk.
        self.tk = min(tk_max, _round_up(in_dim, LANE))
        self.Kp = _round_up(in_dim, self.tk)
        self.Np = _round_up(num_classes, LANE)

        k_enc_w, k_enc_b, k_fc_w, k_fc_b = jax.random.split(key, 4)

        # TODO(synk): frozen linear stand-in for clip_model.encode_image.
        enc_bound = 1.0 / float(in_dim) ** 0.5
        enc_w = jax.random.uniform(k_enc_w, (FEATURE_DIM, in_dim), jnp.float32,
                                   minval=-enc_bound, maxval=enc_bound)
        enc_b = jax.random.uniform(k_enc_b, (FEATURE_DIM,), jnp.float32,
                                   minval=-enc_bound, maxval=enc_bound)
        w_enc_t = jnp.zeros((self.Kp, FEATURE_DIM), jnp.float32)
        w_enc_t = w_enc_t.at[:in_dim, :].set(enc_w.T)
        # TODO(synk): int8 (v5e/v6e) / fp8 (v7x) frozen-weight quantization
        # would halve this dominant HBM stream; bf16 kept for numeric parity.
        self.w_enc = w_enc_t.astype(jnp.bfloat16)                  # [Kp, 512]

        # Trainable head nn.Linear(512, num_classes), pre-transposed, lane-padded.
        fc_bound = 1.0 / float(FEATURE_DIM) ** 0.5
        fc_w = jax.random.uniform(k_fc_w, (num_classes, FEATURE_DIM), jnp.float32,
                                  minval=-fc_bound, maxval=fc_bound)
        fc_b = jax.random.uniform(k_fc_b, (num_classes,), jnp.float32,
                                  minval=-fc_bound, maxval=fc_bound)
        w_fc_t = jnp.zeros((FEATURE_DIM, self.Np), jnp.float32)
        w_fc_t = w_fc_t.at[:, :num_classes].set(fc_w.T)
        self.w_fc = w_fc_t.astype(jnp.bfloat16)                    # [512, Np]

        # Fold both biases: logits = feats @ W_fc + (b_enc @ W_fc^T + b_fc).
        b_comb = jnp.zeros((1, self.Np), jnp.float32)
        b_comb = b_comb.at[0, :num_classes].set(enc_b @ fc_w.T + fc_b)
        self.b_comb = b_comb

        # jit the whole path (pad/flatten + pallas_call) once.
        self._forward = jax.jit(functools.partial(
            _forward_impl, tm_max=tm_max, tk=self.tk, num_classes=num_classes))

    def __call__(self, image):
        # image: [B, C, H, W] (NCHW, PyTorch convention).
        return self._forward(image, self.w_enc, self.w_fc, self.b_comb)


if __name__ == "__main__":
    # Synthetic label map -> num_classes = len(index_to_label)
    index_to_label = {i: f"class_{i}" for i in range(10)}
    num_classes = len(index_to_label)

    key = jax.random.PRNGKey(0)
    k_img, k_params = jax.random.split(key)

    B, C, H, W = 2, 3, 16, 16
    image = jax.random.normal(k_img, (B, C, H, W), dtype=jnp.float32)

    model = CLIPClassifierPallas((C, H, W), num_classes, k_params)
    logits = model(image)
    jax.block_until_ready(logits)

    assert logits.shape == (B, num_classes)
    assert logits.dtype == jnp.float32

    # Plain-JAX reference mirroring the kernel's explicit bf16 rounding
    # (frozen encoder + head) with f32 accumulation and folded bias.
    in_dim = C * H * W
    x_flat = image.reshape(B, -1).astype(jnp.bfloat16)
    acc = jnp.dot(x_flat, model.w_enc[:in_dim, :],
                  preferred_element_type=jnp.float32)
    feats = acc.astype(jnp.bfloat16)
    logits_ref = jnp.dot(feats, model.w_fc[:, :num_classes],
                         preferred_element_type=jnp.float32) \
        + model.b_comb[0, :num_classes]
    assert jnp.allclose(logits, logits_ref, atol=2e-3, rtol=2e-2), (
        float(jnp.max(jnp.abs(logits - logits_ref))))

    print("KERNEL_OK")
</pallas_src>

<mosaic_0001>
module attributes {stable_mosaic.version = 11 : i64} {
  func.func @_clip_fused_kernel(%arg0: i32, %arg1: i32, %arg2: memref<8x768xbf16, #tpu.memory_space<vmem>>, %arg3: memref<768x512xbf16, #tpu.memory_space<vmem>>, %arg4: memref<512x128xbf16, #tpu.memory_space<vmem>>, %arg5: memref<1x128xf32, #tpu.memory_space<vmem>>, %arg6: memref<8x128xf32, #tpu.memory_space<vmem>>, %arg7: memref<1x8x512xf32, #tpu.memory_space<vmem>>) attributes {dimension_semantics = [#tpu.dimension_semantics<arbitrary>, #tpu.dimension_semantics<arbitrary>], iteration_bounds = array<i64: 1, 1>, scalar_prefetch = 0 : i64, scratch_operands = 1 : i64, tpu.core_type = #tpu.core_type<tc>, window_params = [{transform_indices = @transform_0, window_bounds = array<i64: 8, 768>}, {transform_indices = @transform_1, window_bounds = array<i64: 768, 512>}, {pipeline_mode = #tpu.pipeline_mode<synchronous>, transform_indices = @transform_2, window_bounds = array<i64: 512, 128>}, {pipeline_mode = #tpu.pipeline_mode<synchronous>, transform_indices = @transform_3, window_bounds = array<i64: 1, 128>}, {transform_indices = @transform_4, window_bounds = array<i64: 8, 128>}]} {
    %c0_i32 = arith.constant 0 : i32
    %0 = arith.cmpi eq, %arg0, %c0_i32 : i32
    %1 = arith.extui %0 : i1 to i32
    %c0_i32_0 = arith.constant 0 : i32
    %2 = arith.cmpi ne, %1, %c0_i32_0 : i32
    scf.if %2 {
      %cst_10 = arith.constant 0.000000e+00 : f32
      %17 = vector.broadcast %cst_10 : f32 to vector<8x512xf32>
      %18 = arith.index_cast %arg1 : i32 to index
      %c0_11 = arith.constant 0 : index
      %c0_12 = arith.constant 0 : index
      %19 = vector.load %arg7[%18, %c0_11, %c0_12] : memref<1x8x512xf32, #tpu.memory_space<vmem>>, vector<1x8x512xf32>
      %20 = vector.shape_cast %19 : vector<1x8x512xf32> to vector<8x512xf32>
      %21 = vector.shape_cast %17 : vector<8x512xf32> to vector<1x8x512xf32>
      tpu.vector_store %arg7[%18, %c0_11, %c0_12], %21 {strides = array<i32>} : memref<1x8x512xf32, #tpu.memory_space<vmem>>, vector<1x8x512xf32>,
    } else {
    }
    %3 = arith.index_cast %arg1 : i32 to index
    %c0 = arith.constant 0 : index
    %c0_1 = arith.constant 0 : index
    %4 = vector.load %arg7[%3, %c0, %c0_1] : memref<1x8x512xf32, #tpu.memory_space<vmem>>, vector<1x8x512xf32>
    %5 = vector.shape_cast %4 : vector<1x8x512xf32> to vector<8x512xf32>
    %c0_2 = arith.constant 0 : index
    %c0_3 = arith.constant 0 : index
    %6 = vector.load %arg2[%c0_2, %c0_3] : memref<8x768xbf16, #tpu.memory_space<vmem>>, vector<8x768xbf16>
    %c0_4 = arith.constant 0 : index
    %c0_5 = arith.constant 0 : index
    %7 = vector.load %arg3[%c0_4, %c0_5] : memref<768x512xbf16, #tpu.memory_space<vmem>>, vector<768x512xbf16>
    %cst = arith.constant dense<0.000000e+00> : vector<8x512xf32>
    %8 = tpu.matmul %6, %7, %cst {dimension_numbers = #tpu.dot_dimension_numbers<[1], [0], [0], [1], [0, 0, 1, 1], [], []>} : vector<8x768xbf16>, vector<768x512xbf16>, vector<8x512xf32> -> vector<8x512xf32>
    %9 = arith.addf %5, %8 : vector<8x512xf32>
    %10 = arith.index_cast %arg1 : i32 to index
    %c0_6 = arith.constant 0 : index
    %c0_7 = arith.constant 0 : index
    %11 = vector.load %arg7[%10, %c0_6, %c0_7] : memref<1x8x512xf32, #tpu.memory_space<vmem>>, vector<1x8x512xf32>
    %12 = vector.shape_cast %11 : vector<1x8x512xf32> to vector<8x512xf32>
    %13 = vector.shape_cast %9 : vector<8x512xf32> to vector<1x8x512xf32>
    tpu.vector_store %arg7[%10, %c0_6, %c0_7], %13 {strides = array<i32>} : memref<1x8x512xf32, #tpu.memory_space<vmem>>, vector<1x8x512xf32>,
    %c0_i32_8 = arith.constant 0 : i32
    %14 = arith.cmpi eq, %arg0, %c0_i32_8 : i32
    %15 = arith.extui %14 : i1 to i32
    %c0_i32_9 = arith.constant 0 : i32
    %16 = arith.cmpi ne, %15, %c0_i32_9 : i32
    scf.if %16 {
      %17 = arith.index_cast %arg1 : i32 to index
      %c0_10 = arith.constant 0 : index
      %c0_11 = arith.constant 0 : index
      %18 = vector.load %arg7[%17, %c0_10, %c0_11] : memref<1x8x512xf32, #tpu.memory_space<vmem>>, vector<1x8x512xf32>
      %19 = vector.shape_cast %18 : vector<1x8x512xf32> to vector<8x512xf32>
      %20 = arith.truncf %19 : vector<8x512xf32> to vector<8x512xbf16>
      %c0_12 = arith.constant 0 : index
      %c0_13 = arith.constant 0 : index
      %21 = vector.load %arg4[%c0_12, %c0_13] : memref<512x128xbf16, #tpu.memory_space<vmem>>, vector<512x128xbf16>
      %cst_14 = arith.constant dense<0.000000e+00> : vector<8x128xf32>
      %22 = tpu.matmul %20, %21, %cst_14 {dimension_numbers = #tpu.dot_dimension_numbers<[1], [0], [0], [1], [0, 0, 1, 1], [], []>} : vector<8x512xbf16>, vector<512x128xbf16>, vector<8x128xf32> -> vector<8x128xf32>
      %c0_15 = arith.constant 0 : index
      %c0_16 = arith.constant 0 : index
      %23 = vector.load %arg5[%c0_15, %c0_16] : memref<1x128xf32, #tpu.memory_space<vmem>>, vector<1x128xf32>
      %24 = vector.broadcast %23 : vector<1x128xf32> to vector<8x128xf32>
      %25 = arith.addf %22, %24 : vector<8x128xf32>
      %c0_17 = arith.constant 0 : index
      %c0_18 = arith.constant 0 : index
      %26 = vector.load %arg6[%c0_17, %c0_18] : memref<8x128xf32, #tpu.memory_space<vmem>>, vector<8x128xf32>
      tpu.vector_store %arg6[%c0_17, %c0_18], %25 {strides = array<i32>} : memref<8x128xf32, #tpu.memory_space<vmem>>, vector<8x128xf32>,
    } else {
    }
    return
  }
  func.func @transform_0(%arg0: i32, %arg1: i32) -> (i32, i32) {
    %c0_i32 = arith.constant 0 : i32
    return %arg1, %arg0 : i32, i32
  }
  func.func @transform_1(%arg0: i32, %arg1: i32) -> (i32, i32) {
    %c0_i32 = arith.constant 0 : i32
    %c0_i32_0 = arith.constant 0 : i32
    return %arg0, %c0_i32 : i32, i32
  }
  func.func @transform_2(%arg0: i32, %arg1: i32) -> (i32, i32) {
    %c0_i32 = arith.constant 0 : i32
    %c0_i32_0 = arith.constant 0 : i32
    %c0_i32_1 = arith.constant 0 : i32
    return %c0_i32, %c0_i32_0 : i32, i32
  }
  func.func @transform_3(%arg0: i32, %arg1: i32) -> (i32, i32) {
    %c0_i32 = arith.constant 0 : i32
    %c0_i32_0 = arith.constant 0 : i32
    %c0_i32_1 = arith.constant 0 : i32
    return %c0_i32, %c0_i32_0 : i32, i32
  }
  func.func @transform_4(%arg0: i32, %arg1: i32) -> (i32, i32) {
    %c0_i32 = arith.constant 0 : i32
    %c0_i32_0 = arith.constant 0 : i32
    return %arg1, %c0_i32 : i32, i32
  }
}

</mosaic_0001>

<bundles_post_ra>
// kernel: _forward_impl.1
= control target key start
LH: loop header
LB: loop body
LE: loop exit
PB: predicated region body
PF: predicated region fallthrough
CT: control target
= control target key end

     0   :  { %9 = vsyncpa [#allocation4], 0  ;;  %s3166_s0 = inlined_call_operand.vmem [shape: bf16[8,768], index: 0, kind: input, shape index: {}]   ;;  %s3167_s1 = inlined_call_operand.hbm [shape: bf16[768,512], index: 1, kind: input, shape index: {}]   ;;  %s3168_s2 = inlined_call_operand.hbm [shape: bf16[512,128], index: 2, kind: input, shape index: {}]   ;;  %s3169_s3 = inlined_call_operand.vmem [shape: f32[1,128], index: 3, kind: input, shape index: {}]   ;;  %s3170_s4 = inlined_call_operand.vmem [shape: f32[8,128], index: 4, kind: output, shape index: {}]  }
   0x1   :  { %s17_s17 = sshll.u32 %s3167_s1, 4  ;;  %s18_s17 = int_to_ptr.hbm [resolvable:$true] %s17_s17 }
   0x2   :  { %10 = vsyncpa [#allocation6], 0  ;;  %s3072_s18 = smov [#allocation3]   ;;  %s30_s22 = sshll.u32 %s3168_s2, 4  ;;  %s31_s22 = int_to_ptr.hbm [resolvable:$true] %s30_s22 }
   0x3   :  { %s19_s19 = sshll.u32 %s3072_s18, 4  ;;  %s3073_s23 = smov 256   ;;  %s20_s19 = int_to_ptr.vmem [resolvable:$true] %s19_s19 }
   0x4   :  { %s3074_s24 = smov 16   ;;  %s3075_s25 = smov [#allocation5]  }
   0x5   :  { %25 = dma.hbm_to_vmem [thread:$0]  %s18_s17, 24576, %s20_s19, [#allocation4], %s3073_s23, %s3073_s23, %s3074_s24  }
   0x6   :  { %s32_s26 = sshll.u32 %s3075_s25, 4  ;;  %s3076_s27 = smov 64   ;;  %s33_s26 = int_to_ptr.vmem [resolvable:$true] %s32_s26 }
   0x7   :  { %s3077_s28 = smov 4  }
   0x8   :  { %38 = dma.hbm_to_vmem [thread:$0]  %s31_s22, 4096, %s33_s26, [#allocation6], %s3076_s27, %s3076_s27, %s3077_s28  }
   0x9   :  { %3068 = dma.done.wait [#allocation4], 24576  }
   0xa   :  { %3069 = vsyncadd [#allocation4], 4294942720 }
   0xb   :  { %3070 = dma.done.wait [#allocation6], 4096  }
   0xc   :  { %3071 = vsyncadd [#allocation6], 4294963200  ;;  %v2007_v0 = vld [vmem:[#allocation3 + $0xe0] sm:$0xf]  ;;  %v2819_v1 = vld [vmem:[#allocation3 + $0xec] sm:$0xf0] }
   0xd   :  { %v2135_v2 = vld [vmem:[#allocation3 + $0x1e0] sm:$0xf]  ;;  %v2008_v3 = vor.u32 %v2819_v1, %v2007_v0  ;;  %v2851_v4 = vld [vmem:[#allocation3 + $0x1ec] sm:$0xf0] }
   0xe   :  { %v2263_v5 = vld [vmem:[#allocation3 + $0x2e0] sm:$0xf]  ;;  %v2883_v6 = vld [vmem:[#allocation3 + $0x2ec] sm:$0xf0]  ;;  %v2136_v7 = vor.u32 %v2851_v4, %v2135_v2 }
   0xf   :  { %v2264_v8 = vor.u32 %v2883_v6, %v2263_v5  ;;  %v2391_v9 = vld [vmem:[#allocation3 + $0x3e0] sm:$0xf]  ;;  %v2915_v10 = vld [vmem:[#allocation3 + $0x3ec] sm:$0xf0]  ;;  %1243 = vmatpush.bf16.msra.mxu0 %v2008_v3 }
  0x10   :  { %v1991_v11 = vld [vmem:[#allocation3 + $0xc0] sm:$0xf]  ;;  %v2392_v12 = vor.u32 %v2915_v10, %v2391_v9  ;;  %v2815_v13 = vld [vmem:[#allocation3 + $0xcc] sm:$0xf0]  ;;  %1256 = vmatpush.bf16.msra.mxu1 %v2136_v7 }
  0x11   :  { %v2119_v14 = vld [vmem:[#allocation3 + $0x1c0] sm:$0xf]  ;;  %v2847_v15 = vld [vmem:[#allocation3 + $0x1cc] sm:$0xf0]  ;;  %1269 = vmatpush.bf16.msra.mxu2 %v2264_v8  ;;  %v1992_v16 = vor.u32 %v2815_v13, %v1991_v11 }
  0x12   :  { %v2120_v17 = vor.u32 %v2847_v15, %v2119_v14  ;;  %v2247_v18 = vld [vmem:[#allocation3 + $0x2c0] sm:$0xf]  ;;  %v2879_v19 = vld [vmem:[#allocation3 + $0x2cc] sm:$0xf0]  ;;  %1282 = vmatpush.bf16.msra.mxu3 %v2392_v12 }
  0x13   :  { %v2375_v20 = vld [vmem:[#allocation3 + $0x3c0] sm:$0xf]  ;;  %v2248_v21 = vor.u32 %v2879_v19, %v2247_v18  ;;  %v2911_v22 = vld [vmem:[#allocation3 + $0x3cc] sm:$0xf0]  ;;  %1244 = vmatpush.bf16.msra.mxu0 %v1992_v16 }
  0x14   :  { %v1975_v23 = vld [vmem:[#allocation3 + $0xa0] sm:$0xf]  ;;  %v2811_v24 = vld [vmem:[#allocation3 + $0xac] sm:$0xf0]  ;;  %v2376_v25 = vor.u32 %v2911_v22, %v2375_v20  ;;  %1257 = vmatpush.bf16.msra.mxu1 %v2120_v17 }
  0x15   :  { %v2103_v26 = vld [vmem:[#allocation3 + $0x1a0] sm:$0xf]  ;;  %v2843_v27 = vld [vmem:[#allocation3 + $0x1ac] sm:$0xf0]  ;;  %v1976_v29 = vor.u32 %v2811_v24, %v1975_v23  ;;  %1270 = vmatpush.bf16.msra.mxu2 %v2248_v21 }
  0x16   :  { %v2231_v28 = vld [vmem:[#allocation3 + $0x2a0] sm:$0xf]  ;;  %v2875_v30 = vld [vmem:[#allocation3 + $0x2ac] sm:$0xf0]  ;;  %v2104_v33 = vor.u32 %v2843_v27, %v2103_v26  ;;  %1283 = vmatpush.bf16.msra.mxu3 %v2376_v25 }
  0x17   :  { %v2359_v31 = vld [vmem:[#allocation3 + $0x3a0] sm:$0xf]  ;;  %v2907_v32 = vld [vmem:[#allocation3 + $0x3ac] sm:$0xf0]  ;;  %v2232_v34 = vor.u32 %v2875_v30, %v2231_v28  ;;  %1245 = vmatpush.bf16.msra.mxu0 %v1976_v29 }
  0x18   :  { %v1959_v35 = vld [vmem:[#allocation3 + $0x80] sm:$0xf]  ;;  %v2807_v36 = vld [vmem:[#allocation3 + $0x8c] sm:$0xf0]  ;;  %v2360_v38 = vor.u32 %v2907_v32, %v2359_v31  ;;  %1258 = vmatpush.bf16.msra.mxu1 %v2104_v33  ;;  %v2817_v33 = vld [vmem:[#allocation3 + $0xe4] sm:$0xf] }
  0x19   :  { %v2087_v37 = vld [vmem:[#allocation3 + $0x180] sm:$0xf]  ;;  %v2839_v39 = vld [vmem:[#allocation3 + $0x18c] sm:$0xf0]  ;;  %v1960_v44 = vor.u32 %v2807_v36, %v1959_v35  ;;  %1271 = vmatpush.bf16.msra.mxu2 %v2232_v34  ;;  %v2009_v34 = vld [vmem:[#allocation3 + $0xf0] sm:$0xf0] }
  0x1a   :  { %v2215_v40 = vld [vmem:[#allocation3 + $0x280] sm:$0xf]  ;;  %v2871_v41 = vld [vmem:[#allocation3 + $0x28c] sm:$0xf0]  ;;  %v2088_v45 = vor.u32 %v2839_v39, %v2087_v37  ;;  %1284 = vmatpush.bf16.msra.mxu3 %v2360_v38  ;;  %v2849_v37 = vld [vmem:[#allocation3 + $0x1e4] sm:$0xf] }
  0x1b   :  { %v2343_v42 = vld [vmem:[#allocation3 + $0x380] sm:$0xf]  ;;  %v2903_v43 = vld [vmem:[#allocation3 + $0x38c] sm:$0xf0]  ;;  %v2216_v46 = vor.u32 %v2871_v41, %v2215_v40  ;;  %1246 = vmatpush.bf16.msra.mxu0 %v1960_v44  ;;  %v2137_v38 = vld [vmem:[#allocation3 + $0x1f0] sm:$0xf0] }
  0x1c   :  { %v1943_v47 = vld [vmem:[#allocation3 + $0x60] sm:$0xf]  ;;  %v2803_v48 = vld [vmem:[#allocation3 + $0x6c] sm:$0xf0]  ;;  %v2344_v50 = vor.u32 %v2903_v43, %v2343_v42  ;;  %1259 = vmatpush.bf16.msra.mxu1 %v2088_v45  ;;  %v2012_v42 = vor.u32 %v2817_v33, %v2009_v34  ;;  %v2073_v33 = vld [vmem:[#allocation3 + $0x170] sm:$0xf0] }
  0x1d   :  { %v2071_v49 = vld [vmem:[#allocation3 + $0x160] sm:$0xf]  ;;  %v2835_v51 = vld [vmem:[#allocation3 + $0x16c] sm:$0xf0]  ;;  %v1944_v56 = vor.u32 %v2803_v48, %v1943_v47  ;;  %1272 = vmatpush.bf16.msra.mxu2 %v2216_v46  ;;  %v2140_v46 = vor.u32 %v2849_v37, %v2137_v38  ;;  %v2813_v48 = vld [vmem:[#allocation3 + $0xc4] sm:$0xf] }
  0x1e   :  { %v2199_v52 = vld [vmem:[#allocation3 + $0x260] sm:$0xf]  ;;  %v2867_v53 = vld [vmem:[#allocation3 + $0x26c] sm:$0xf0]  ;;  %v2072_v57 = vor.u32 %v2835_v51, %v2071_v49  ;;  %1285 = vmatpush.bf16.msra.mxu3 %v2344_v50  ;;  %v1993_v49 = vld [vmem:[#allocation3 + $0xd0] sm:$0xf0] }
  0x1f   :  { %v2327_v54 = vld [vmem:[#allocation3 + $0x360] sm:$0xf]  ;;  %v2899_v55 = vld [vmem:[#allocation3 + $0x36c] sm:$0xf0]  ;;  %v2200_v58 = vor.u32 %v2867_v53, %v2199_v52  ;;  %1247 = vmatpush.bf16.msra.mxu0 %v1944_v56  ;;  %v2845_v50 = vld [vmem:[#allocation3 + $0x1c4] sm:$0xf] }
  0x20   :  { %v1927_v59 = vld [vmem:[#allocation3 + $0x40] sm:$0xf]  ;;  %v2799_v60 = vld [vmem:[#allocation3 + $0x4c] sm:$0xf0]  ;;  %v2328_v62 = vor.u32 %v2899_v55, %v2327_v54  ;;  %1260 = vmatpush.bf16.msra.mxu1 %v2072_v57  ;;  %v2121_v51 = vld [vmem:[#allocation3 + $0x1d0] sm:$0xf0]  ;;  %v1996_v55 = vor.u32 %v2813_v48, %v1993_v49 }
  0x21   :  { %v2055_v61 = vld [vmem:[#allocation3 + $0x140] sm:$0xf]  ;;  %v2831_v63 = vld [vmem:[#allocation3 + $0x14c] sm:$0xf0]  ;;  %v1928_v4 = vor.u32 %v2799_v60, %v1927_v59  ;;  %1273 = vmatpush.bf16.msra.mxu2 %v2200_v58  ;;  %v2124_v59 = vor.u32 %v2845_v50, %v2121_v51  ;;  %v2809_v60 = vld [vmem:[#allocation3 + $0xa4] sm:$0xf] }
  0x22   :  { %v2183_v0 = vld [vmem:[#allocation3 + $0x240] sm:$0xf]  ;;  %v2863_v1 = vld [vmem:[#allocation3 + $0x24c] sm:$0xf0]  ;;  %v2056_v5 = vor.u32 %v2831_v63, %v2055_v61  ;;  %1286 = vmatpush.bf16.msra.mxu3 %v2328_v62  ;;  %v1977_v61 = vld [vmem:[#allocation3 + $0xb0] sm:$0xf0] }
  0x23   :  { %v2311_v2 = vld [vmem:[#allocation3 + $0x340] sm:$0xf]  ;;  %v2895_v3 = vld [vmem:[#allocation3 + $0x34c] sm:$0xf0]  ;;  %v2184_v6 = vor.u32 %v2863_v1, %v2183_v0  ;;  %1248 = vmatpush.bf16.msra.mxu0 %v1928_v4  ;;  %v2841_v62 = vld [vmem:[#allocation3 + $0x1a4] sm:$0xf]  ;;  %v1980_v4 = vor.u32 %v2809_v60, %v1977_v61 }
  0x24   :  { %v1911_v7 = vld [vmem:[#allocation3 + $0x20] sm:$0xf]  ;;  %v2795_v8 = vld [vmem:[#allocation3 + $0x2c] sm:$0xf0]  ;;  %v2312_v10 = vor.u32 %v2895_v3, %v2311_v2  ;;  %1261 = vmatpush.bf16.msra.mxu1 %v2056_v5  ;;  %v2105_v63 = vld [vmem:[#allocation3 + $0x1b0] sm:$0xf0] }
  0x25   :  { %v2039_v9 = vld [vmem:[#allocation3 + $0x120] sm:$0xf]  ;;  %v2827_v11 = vld [vmem:[#allocation3 + $0x12c] sm:$0xf0]  ;;  %v1912_v16 = vor.u32 %v2795_v8, %v1911_v7  ;;  %1274 = vmatpush.bf16.msra.mxu2 %v2184_v6  ;;  %v68_v3 = vld [vmem:[%s3166_s0 + $0x8] sm:$0xff] }
  0x26   :  { %v2167_v12 = vld [vmem:[#allocation3 + $0x220] sm:$0xf]  ;;  %v2859_v13 = vld [vmem:[#allocation3 + $0x22c] sm:$0xf0]  ;;  %v2040_v19 = vor.u32 %v2827_v11, %v2039_v9  ;;  %1287 = vmatpush.bf16.msra.mxu3 %v2312_v10  ;;  %v267_v9 = vunpack.c.l.b16 %v68_v3  ;;  %v2108_v11 = vor.u32 %v2841_v62, %v2105_v63 }
  0x27   :  { %v2295_v14 = vld [vmem:[#allocation3 + $0x320] sm:$0xf]  ;;  %v2891_v15 = vld [vmem:[#allocation3 + $0x32c] sm:$0xf0]  ;;  %v2168_v20 = vor.u32 %v2859_v13, %v2167_v12  ;;  %1249 = vmatpush.bf16.msra.mxu0 %v1912_v16  ;;  %v2805_v13 = vld [vmem:[#allocation3 + $0x84] sm:$0xf] }
  0x28   :  { %v1895_v17 = vld [vmem:[#allocation3] sm:$0xf]  ;;  %v2791_v18 = vld [vmem:[#allocation3 + $0xc] sm:$0xf0]  ;;  %v2296_v24 = vor.u32 %v2891_v15, %v2295_v14  ;;  %1262 = vmatpush.bf16.msra.mxu1 %v2040_v19  ;;  %v1961_v14 = vld [vmem:[#allocation3 + $0x90] sm:$0xf0]  ;;  %v268_v15 = vunpack.c.h.b16 %v68_v3  ;;  %v3117_v19 = vpack.c.b16 %v267_v9, %v267_v9 }
  0x29   :  { %v2023_v21 = vld [vmem:[#allocation3 + $0x100] sm:$0xf]  ;;  %v2823_v22 = vld [vmem:[#allocation3 + $0x10c] sm:$0xf0]  ;;  %v1896_v31 = vor.u32 %v2791_v18, %v1895_v17  ;;  %1275 = vmatpush.bf16.msra.mxu2 %v2168_v20  ;;  %v2837_v16 = vld [vmem:[#allocation3 + $0x184] sm:$0xf] }
  0x2a   :  { %v2151_v23 = vld [vmem:[#allocation3 + $0x200] sm:$0xf]  ;;  %v2855_v25 = vld [vmem:[#allocation3 + $0x20c] sm:$0xf0]  ;;  %v2024_v35 = vor.u32 %v2823_v22, %v2023_v21  ;;  %1288 = vmatpush.bf16.msra.mxu3 %v2296_v24  ;;  %v2089_v17 = vld [vmem:[#allocation3 + $0x190] sm:$0xf0]  ;;  %v3121_v22 = vpack.c.b16 %v268_v15, %v268_v15  ;;  %v1964_v24 = vor.u32 %v2805_v13, %v1961_v14 }
  0x2b   :  { %v2279_v26 = vld [vmem:[#allocation3 + $0x300] sm:$0xf]  ;;  %v2887_v27 = vld [vmem:[#allocation3 + $0x30c] sm:$0xf0]  ;;  %v2152_v36 = vor.u32 %v2855_v25, %v2151_v23  ;;  %1250 = vmatpush.bf16.msra.mxu0 %v1896_v31  ;;  %v1945_v31 = vld [vmem:[#allocation3 + $0x70] sm:$0xf0] }
  0x2c   :  { %v2519_v28 = vld [vmem:[#allocation3 + $0x4e0] sm:$0xf]  ;;  %v2947_v29 = vld [vmem:[#allocation3 + $0x4ec] sm:$0xf0]  ;;  %v2280_v39 = vor.u32 %v2887_v27, %v2279_v26  ;;  %1263 = vmatpush.bf16.msra.mxu1 %v2024_v35  ;;  %v2913_v9 = vld [vmem:[#allocation3 + $0x3e4] sm:$0xf] }
  0x2d   :  { %v2647_v30 = vld [vmem:[#allocation3 + $0x5e0] sm:$0xf]  ;;  %v2979_v32 = vld [vmem:[#allocation3 + $0x5ec] sm:$0xf0]  ;;  %v2520_v40 = vor.u32 %v2947_v29, %v2519_v28  ;;  %1276 = vmatpush.bf16.msra.mxu2 %v2152_v36  ;;  %v2092_v28 = vor.u32 %v2837_v16, %v2089_v17  ;;  %v2521_v13 = vld [vmem:[#allocation3 + $0x4f0] sm:$0xf0] }
  0x2e   :  { %v2648_v41 = vor.u32 %v2979_v32, %v2647_v30  ;;  %v2503_v43 = vld [vmem:[#allocation3 + $0x4c0] sm:$0xf]  ;;  %v2943_v44 = vld [vmem:[#allocation3 + $0x4cc] sm:$0xf0]  ;;  %1289 = vmatpush.bf16.msra.mxu3 %v2280_v39  ;;  %v2801_v30 = vld [vmem:[#allocation3 + $0x64] sm:$0xf] }
  0x2f   :  { %v2631_v45 = vld [vmem:[#allocation3 + $0x5c0] sm:$0xf]  ;;  %v2975_v47 = vld [vmem:[#allocation3 + $0x5cc] sm:$0xf0]  ;;  %1295 = vmatpush.bf16.msrb.mxu0 %v2520_v40  ;;  %v2504_v52 = vor.u32 %v2943_v44, %v2503_v43  ;;  %v2833_v32 = vld [vmem:[#allocation3 + $0x164] sm:$0xf]  ;;  %v1948_v36 = vor.u32 %v2801_v30, %v1945_v31 }
  0x30   :  { %v2487_v53 = vld [vmem:[#allocation3 + $0x4a0] sm:$0xf]  ;;  %1308 = vmatpush.bf16.msrb.mxu1 %v2648_v41  ;;  %v2632_v54 = vor.u32 %v2975_v47, %v2631_v45  ;;  %v2939_v56 = vld [vmem:[#allocation3 + $0x4ac] sm:$0xf0]  ;;  %1277 = vmatmul.bf16.vlgmr.msra.gmra.mxu2 %v3117_v19  ;;  %v2076_v40 = vor.u32 %v2833_v32, %v2073_v33  ;;  %v1929_v43 = vld [vmem:[#allocation3 + $0x50] sm:$0xf0] }
  0x31   :  { %1321 = vmatpush.bf16.msrb.mxu2 %v2012_v42  ;;  %v2615_v57 = vld [vmem:[#allocation3 + $0x5a0] sm:$0xf]  ;;  %v2971_v58 = vld [vmem:[#allocation3 + $0x5ac] sm:$0xf0]  ;;  %v2488_v0 = vor.u32 %v2939_v56, %v2487_v53  ;;  %1290 = vmatmul.bf16.vlgmr.msra.gmra.mxu3 %v3121_v22  ;;  %v2797_v42 = vld [vmem:[#allocation3 + $0x44] sm:$0xf] }
  0x32   :  { %1334 = vmatpush.bf16.msrb.mxu3 %v2140_v46  ;;  %v2616_v1 = vor.u32 %v2971_v58, %v2615_v57  ;;  %v67_v2 = vld [vmem:[%s3166_s0] sm:$0xff]  ;;  %v2935_v6 = vld [vmem:[#allocation3 + $0x48c] sm:$0xf0]  ;;  %v2057_v45 = vld [vmem:[#allocation3 + $0x150] sm:$0xf0]  ;;  %v1932_v48 = vor.u32 %v2797_v42, %v1929_v43 }
  0x33   :  { %1296 = vmatpush.bf16.msrb.mxu0 %v2504_v52  ;;  %v2471_v5 = vld [vmem:[#allocation3 + $0x480] sm:$0xf]  ;;  %v265_v8 = vunpack.c.l.b16 %v67_v2  ;;  %v266_v10 = vunpack.c.h.b16 %v67_v2  ;;  %v2967_v12 = vld [vmem:[#allocation3 + $0x58c] sm:$0xf0]  ;;  %v2829_v44 = vld [vmem:[#allocation3 + $0x144] sm:$0xf] }
  0x34   :  { %1309 = vmatpush.bf16.msrb.mxu1 %v2632_v54  ;;  %v2599_v7 = vld [vmem:[#allocation3 + $0x580] sm:$0xf]  ;;  %v2472_v21 = vor.u32 %v2935_v6, %v2471_v5  ;;  %v2931_v26 = vld [vmem:[#allocation3 + $0x46c] sm:$0xf0]  ;;  %v2060_v52 = vor.u32 %v2829_v44, %v2057_v45  ;;  %v2793_v54 = vld [vmem:[#allocation3 + $0x24] sm:$0xf] }
  0x35   :  { %1322 = vmatpush.bf16.msrb.mxu2 %v1996_v55  ;;  %v3115_v18 = vpack.c.b16 %v265_v8, %v265_v8  ;;  %v3119_v20 = vpack.c.b16 %v266_v10, %v266_v10  ;;  %v2600_v23 = vor.u32 %v2967_v12, %v2599_v7  ;;  %v2455_v25 = vld [vmem:[#allocation3 + $0x460] sm:$0xf]  ;;  %v2963_v29 = vld [vmem:[#allocation3 + $0x56c] sm:$0xf0]  ;;  %v1913_v55 = vld [vmem:[#allocation3 + $0x30] sm:$0xf0] }
  0x36   :  { %1335 = vmatpush.bf16.msrb.mxu3 %v2124_v59  ;;  %v2583_v27 = vld [vmem:[#allocation3 + $0x560] sm:$0xf]  ;;  %v2456_v34 = vor.u32 %v2931_v26, %v2455_v25  ;;  %v2927_v38 = vld [vmem:[#allocation3 + $0x44c] sm:$0xf0]  ;;  %v2825_v56 = vld [vmem:[#allocation3 + $0x124] sm:$0xf]  ;;  %v1916_v63 = vor.u32 %v2793_v54, %v1913_v55 }
  0x37   :  { %1297 = vmatpush.bf16.msrb.mxu0 %v2488_v0  ;;  %1264 = vmatmul.bf16.vlgmr.msra.gmra.mxu1 %v3119_v20  ;;  %v2584_v35 = vor.u32 %v2963_v29, %v2583_v27  ;;  %v2439_v37 = vld [vmem:[#allocation3 + $0x440] sm:$0xf]  ;;  %v2959_v41 = vld [vmem:[#allocation3 + $0x54c] sm:$0xf0]  ;;  %v2041_v57 = vld [vmem:[#allocation3 + $0x130] sm:$0xf0] }
  0x38   :  { %1310 = vmatpush.bf16.msrb.mxu1 %v2616_v1  ;;  %1251 = vmatmul.bf16.vlgmr.msra.gmra.mxu0 %v3115_v18  ;;  %v2567_v39 = vld [vmem:[#allocation3 + $0x540] sm:$0xf]  ;;  %v2440_v46 = vor.u32 %v2927_v38, %v2439_v37  ;;  %v2923_v50 = vld [vmem:[#allocation3 + $0x42c] sm:$0xf0]  ;;  %v2789_v1 = vld [vmem:[#allocation3 + $0x4] sm:$0xf]  ;;  %v2044_v3 = vor.u32 %v2825_v56, %v2041_v57 }
  0x39   :  { %1323 = vmatpush.bf16.msrb.mxu2 %v1980_v4  ;;  %v2568_v47 = vor.u32 %v2959_v41, %v2567_v39  ;;  %v2423_v49 = vld [vmem:[#allocation3 + $0x420] sm:$0xf]  ;;  %v2955_v53 = vld [vmem:[#allocation3 + $0x52c] sm:$0xf0]  ;;  %v1897_v4 = vld [vmem:[#allocation3 + $0x10] sm:$0xf0] }
  0x3a   :  { %1336 = vmatpush.bf16.msrb.mxu3 %v2108_v11  ;;  %v2551_v51 = vld [vmem:[#allocation3 + $0x520] sm:$0xf]  ;;  %v2424_v58 = vor.u32 %v2923_v50, %v2423_v49  ;;  %v2919_v60 = vld [vmem:[#allocation3 + $0x40c] sm:$0xf0]  ;;  %v2821_v5 = vld [vmem:[#allocation3 + $0x104] sm:$0xf]  ;;  %v1900_v16 = vor.u32 %v2789_v1, %v1897_v4 }
  0x3b   :  { %1298 = vmatpush.bf16.msrb.mxu0 %v2472_v21  ;;  %v2407_v59 = vld [vmem:[#allocation3 + $0x400] sm:$0xf]  ;;  %v2552_v62 = vor.u32 %v2955_v53, %v2551_v51  ;;  %v2951_v0 = vld [vmem:[#allocation3 + $0x50c] sm:$0xf0]  ;;  %v2025_v6 = vld [vmem:[#allocation3 + $0x110] sm:$0xf0] }
  0x3c   :  { %1311 = vmatpush.bf16.msrb.mxu1 %v2600_v23  ;;  %v2535_v61 = vld [vmem:[#allocation3 + $0x500] sm:$0xf]  ;;  %v69_v2 = vld [vmem:[%s3166_s0 + $0x10] sm:$0xff]  ;;  %v2881_v7 = vld [vmem:[#allocation3 + $0x2e4] sm:$0xf]  ;;  %v2408_v10 = vor.u32 %v2919_v60, %v2407_v59 }
  0x3d   :  { %1324 = vmatpush.bf16.msrb.mxu2 %v1964_v24  ;;  %v2265_v8 = vld [vmem:[#allocation3 + $0x2f0] sm:$0xf0]  ;;  %v2945_v12 = vld [vmem:[#allocation3 + $0x4e4] sm:$0xf]  ;;  %v269_v14 = vunpack.c.l.b16 %v69_v2  ;;  %v2536_v15 = vor.u32 %v2951_v0, %v2535_v61  ;;  %v270_v23 = vunpack.c.h.b16 %v69_v2  ;;  %v2028_v24 = vor.u32 %v2821_v5, %v2025_v6 }
  0x3e   :  { %1337 = vmatpush.bf16.msrb.mxu3 %v2092_v28  ;;  %v2393_v11 = vld [vmem:[#allocation3 + $0x3f0] sm:$0xf0]  ;;  %v2977_v17 = vld [vmem:[#allocation3 + $0x5e4] sm:$0xf]  ;;  %v2268_v25 = vor.u32 %v2881_v7, %v2265_v8  ;;  %v2524_v27 = vor.u32 %v2945_v12, %v2521_v13 }
  0x3f   :  { %1299 = vmatpush.bf16.msrb.mxu0 %v2456_v34  ;;  %v2649_v21 = vld [vmem:[#allocation3 + $0x5f0] sm:$0xf0]  ;;  %v2396_v26 = vor.u32 %v2913_v9, %v2393_v11  ;;  %v2877_v28 = vld [vmem:[#allocation3 + $0x2c4] sm:$0xf]  ;;  %v3132_v38 = vpack.c.b16 %v270_v23, %v270_v23 }
  0x40   :  { %1312 = vmatpush.bf16.msrb.mxu1 %v2584_v35  ;;  %v2249_v29 = vld [vmem:[#allocation3 + $0x2d0] sm:$0xf0]  ;;  %v2909_v30 = vld [vmem:[#allocation3 + $0x3c4] sm:$0xf]  ;;  %v2652_v31 = vor.u32 %v2977_v17, %v2649_v21  ;;  %v3130_v35 = vpack.c.b16 %v269_v14, %v269_v14 }
  0x41   :  { %1325 = vmatpush.bf16.msrb.mxu2 %v1948_v36  ;;  %v2377_v32 = vld [vmem:[#allocation3 + $0x3d0] sm:$0xf0]  ;;  %v2941_v33 = vld [vmem:[#allocation3 + $0x4c4] sm:$0xf]  ;;  %v2252_v39 = vor.u32 %v2877_v28, %v2249_v29 }
  0x42   :  { %1338 = vmatpush.bf16.msrb.mxu3 %v2076_v40  ;;  %v2505_v34 = vld [vmem:[#allocation3 + $0x4d0] sm:$0xf0]  ;;  %v2973_v36 = vld [vmem:[#allocation3 + $0x5c4] sm:$0xf]  ;;  %v2380_v40 = vor.u32 %v2909_v30, %v2377_v32 }
  0x43   :  { %1300 = vmatpush.bf16.msrb.mxu0 %v2440_v46  ;;  %v2633_v37 = vld [vmem:[#allocation3 + $0x5d0] sm:$0xf0]  ;;  %v2508_v41 = vor.u32 %v2941_v33, %v2505_v34  ;;  %v2873_v42 = vld [vmem:[#allocation3 + $0x2a4] sm:$0xf] }
  0x44   :  { %1313 = vmatpush.bf16.msrb.mxu1 %v2568_v47  ;;  %v2233_v43 = vld [vmem:[#allocation3 + $0x2b0] sm:$0xf0]  ;;  %v2905_v44 = vld [vmem:[#allocation3 + $0x3a4] sm:$0xf]  ;;  %v2636_v45 = vor.u32 %v2973_v36, %v2633_v37 }
  0x45   :  { %1326 = vmatpush.bf16.msrb.mxu2 %v1932_v48  ;;  %v2361_v46 = vld [vmem:[#allocation3 + $0x3b0] sm:$0xf0]  ;;  %v2937_v47 = vld [vmem:[#allocation3 + $0x4a4] sm:$0xf]  ;;  %v2236_v51 = vor.u32 %v2873_v42, %v2233_v43 }
  0x46   :  { %1339 = vmatpush.bf16.msrb.mxu3 %v2060_v52  ;;  %v2489_v48 = vld [vmem:[#allocation3 + $0x4b0] sm:$0xf0]  ;;  %v2969_v49 = vld [vmem:[#allocation3 + $0x5a4] sm:$0xf]  ;;  %v2364_v52 = vor.u32 %v2905_v44, %v2361_v46 }
  0x47   :  { %1301 = vmatpush.bf16.msrb.mxu0 %v2424_v58  ;;  %v2617_v50 = vld [vmem:[#allocation3 + $0x5b0] sm:$0xf0]  ;;  %v2492_v53 = vor.u32 %v2937_v47, %v2489_v48  ;;  %v2869_v54 = vld [vmem:[#allocation3 + $0x284] sm:$0xf] }
  0x48   :  { %1314 = vmatpush.bf16.msrb.mxu1 %v2552_v62  ;;  %v2217_v55 = vld [vmem:[#allocation3 + $0x290] sm:$0xf0]  ;;  %v2901_v56 = vld [vmem:[#allocation3 + $0x384] sm:$0xf]  ;;  %v2620_v57 = vor.u32 %v2969_v49, %v2617_v50 }
  0x49   :  { %1327 = vmatpush.bf16.msrb.mxu2 %v1916_v63  ;;  %v2345_v58 = vld [vmem:[#allocation3 + $0x390] sm:$0xf0]  ;;  %v2933_v59 = vld [vmem:[#allocation3 + $0x484] sm:$0xf]  ;;  %v2220_v63 = vor.u32 %v2869_v54, %v2217_v55  ;;  %v2820_v54 = vld [vmem:[#allocation3 + $0xf4] sm:$0xf0] }
  0x4a   :  { %1340 = vmatpush.bf16.msrb.mxu3 %v2044_v3  ;;  %v2473_v60 = vld [vmem:[#allocation3 + $0x490] sm:$0xf0]  ;;  %v2965_v61 = vld [vmem:[#allocation3 + $0x584] sm:$0xf]  ;;  %v2348_v0 = vor.u32 %v2901_v56, %v2345_v58  ;;  %v2143_v55 = vld [vmem:[#allocation3 + $0x1e8] sm:$0xf] }
  0x4b   :  { %1302 = vmatpush.bf16.msrb.mxu0 %v2408_v10  ;;  %v2601_v62 = vld [vmem:[#allocation3 + $0x590] sm:$0xf0]  ;;  %v2476_v1 = vor.u32 %v2933_v59, %v2473_v60  ;;  %v2865_v2 = vld [vmem:[#allocation3 + $0x264] sm:$0xf]  ;;  %v2271_v58 = vld [vmem:[#allocation3 + $0x2e8] sm:$0xf] }
  0x4c   :  { %1315 = vmatpush.bf16.msrb.mxu1 %v2536_v15  ;;  %v2201_v3 = vld [vmem:[#allocation3 + $0x270] sm:$0xf0]  ;;  %v2897_v4 = vld [vmem:[#allocation3 + $0x364] sm:$0xf]  ;;  %v2604_v5 = vor.u32 %v2965_v61, %v2601_v62  ;;  %v2884_v59 = vld [vmem:[#allocation3 + $0x2f4] sm:$0xf0] }
  0x4d   :  { %1328 = vmatpush.bf16.msrb.mxu2 %v1900_v16  ;;  %v2329_v6 = vld [vmem:[#allocation3 + $0x370] sm:$0xf0]  ;;  %v2929_v7 = vld [vmem:[#allocation3 + $0x464] sm:$0xf]  ;;  %v2204_v11 = vor.u32 %v2865_v2, %v2201_v3  ;;  %v2399_v62 = vld [vmem:[#allocation3 + $0x3e8] sm:$0xf]  ;;  %v2272_v3 = vor.u32 %v2884_v59, %v2271_v58 }
  0x4e   :  { %1341 = vmatpush.bf16.msrb.mxu3 %v2028_v24  ;;  %1303 = vmatmul.bf16.vlgmr.msrb.gmra.mxu0 %v3130_v35  ;;  %v2457_v8 = vld [vmem:[#allocation3 + $0x470] sm:$0xf0]  ;;  %v2961_v9 = vld [vmem:[#allocation3 + $0x564] sm:$0xf]  ;;  %v2332_v12 = vor.u32 %v2897_v4, %v2329_v6  ;;  %v1999_v4 = vld [vmem:[#allocation3 + $0xc8] sm:$0xf] }
  0x4f   :  { %1347 = vmatpush.bf16.msra.mxu0 %v2268_v25  ;;  %1316 = vmatmul.bf16.vlgmr.msrb.gmra.mxu1 %v3132_v38  ;;  %v2585_v10 = vld [vmem:[#allocation3 + $0x570] sm:$0xf0]  ;;  %v2460_v13 = vor.u32 %v2929_v7, %v2457_v8  ;;  %v2861_v14 = vld [vmem:[#allocation3 + $0x244] sm:$0xf]  ;;  %v2127_v6 = vld [vmem:[#allocation3 + $0x1c8] sm:$0xf] }
  0x50   :  { %1360 = vmatpush.bf16.msra.mxu1 %v2396_v26  ;;  %1329 = vmatmul.bf16.vlgmr.msrb.gmra.mxu2 %v3115_v18  ;;  %v2185_v15 = vld [vmem:[#allocation3 + $0x250] sm:$0xf0]  ;;  %v2893_v16 = vld [vmem:[#allocation3 + $0x344] sm:$0xf]  ;;  %v2588_v17 = vor.u32 %v2961_v9, %v2585_v10  ;;  %v2848_v8 = vld [vmem:[#allocation3 + $0x1d4] sm:$0xf0] }
  0x51   :  { %1373 = vmatpush.bf16.msra.mxu2 %v2524_v27  ;;  %1342 = vmatmul.bf16.vlgmr.msrb.gmra.mxu3 %v3119_v20  ;;  %v2313_v21 = vld [vmem:[#allocation3 + $0x350] sm:$0xf0]  ;;  %v2925_v23 = vld [vmem:[#allocation3 + $0x444] sm:$0xf]  ;;  %v2188_v27 = vor.u32 %v2861_v14, %v2185_v15  ;;  %v2255_v9 = vld [vmem:[#allocation3 + $0x2c8] sm:$0xf]  ;;  %v2128_v14 = vor.u32 %v2848_v8, %v2127_v6 }
  0x52   :  { %1386 = vmatpush.bf16.msra.mxu3 %v2652_v31  ;;  %v2441_v24 = vld [vmem:[#allocation3 + $0x450] sm:$0xf0]  ;;  %v2957_v25 = vld [vmem:[#allocation3 + $0x544] sm:$0xf]  ;;  %v2316_v28 = vor.u32 %v2893_v16, %v2313_v21  ;;  %v2880_v10 = vld [vmem:[#allocation3 + $0x2d4] sm:$0xf0] }
  0x53   :  { %1348 = vmatpush.bf16.msra.mxu0 %v2252_v39  ;;  %v2569_v26 = vld [vmem:[#allocation3 + $0x550] sm:$0xf0]  ;;  %v2444_v29 = vor.u32 %v2925_v23, %v2441_v24  ;;  %v2857_v30 = vld [vmem:[#allocation3 + $0x224] sm:$0xf]  ;;  %v2256_v15 = vor.u32 %v2880_v10, %v2255_v9  ;;  %v1983_v16 = vld [vmem:[#allocation3 + $0xa8] sm:$0xf] }
  0x54   :  { %1361 = vmatpush.bf16.msra.mxu1 %v2380_v40  ;;  %v2169_v31 = vld [vmem:[#allocation3 + $0x230] sm:$0xf0]  ;;  %v2889_v32 = vld [vmem:[#allocation3 + $0x324] sm:$0xf]  ;;  %v2572_v33 = vor.u32 %v2957_v25, %v2569_v26  ;;  %v2111_v21 = vld [vmem:[#allocation3 + $0x1a8] sm:$0xf] }
  0x55   :  { %1374 = vmatpush.bf16.msra.mxu2 %v2508_v41  ;;  %v2297_v34 = vld [vmem:[#allocation3 + $0x330] sm:$0xf0]  ;;  %v2921_v36 = vld [vmem:[#allocation3 + $0x424] sm:$0xf]  ;;  %v2172_v41 = vor.u32 %v2857_v30, %v2169_v31  ;;  %v2844_v24 = vld [vmem:[#allocation3 + $0x1b4] sm:$0xf0] }
  0x56   :  { %1387 = vmatpush.bf16.msra.mxu3 %v2636_v45  ;;  %v2425_v37 = vld [vmem:[#allocation3 + $0x430] sm:$0xf0]  ;;  %v2953_v39 = vld [vmem:[#allocation3 + $0x524] sm:$0xf]  ;;  %v2300_v44 = vor.u32 %v2889_v32, %v2297_v34  ;;  %v2239_v25 = vld [vmem:[#allocation3 + $0x2a8] sm:$0xf]  ;;  %v2112_v30 = vor.u32 %v2844_v24, %v2111_v21 }
  0x57   :  { %1349 = vmatpush.bf16.msra.mxu0 %v2236_v51  ;;  %v2553_v40 = vld [vmem:[#allocation3 + $0x530] sm:$0xf0]  ;;  %v2853_v42 = vld [vmem:[#allocation3 + $0x204] sm:$0xf]  ;;  %v2428_v45 = vor.u32 %v2921_v36, %v2425_v37  ;;  %v2876_v26 = vld [vmem:[#allocation3 + $0x2b4] sm:$0xf0] }
  0x58   :  { %1362 = vmatpush.bf16.msra.mxu1 %v2364_v52  ;;  %v2153_v43 = vld [vmem:[#allocation3 + $0x210] sm:$0xf0]  ;;  %v2885_v46 = vld [vmem:[#allocation3 + $0x304] sm:$0xf]  ;;  %v2556_v49 = vor.u32 %v2953_v39, %v2553_v40  ;;  %v2240_v31 = vor.u32 %v2876_v26, %v2239_v25  ;;  %v1967_v32 = vld [vmem:[#allocation3 + $0x88] sm:$0xf] }
  0x59   :  { %1375 = vmatpush.bf16.msra.mxu2 %v2492_v53  ;;  %v2281_v47 = vld [vmem:[#allocation3 + $0x310] sm:$0xf0]  ;;  %v2917_v48 = vld [vmem:[#allocation3 + $0x404] sm:$0xf]  ;;  %v2015_v53 = vld [vmem:[#allocation3 + $0xe8] sm:$0xf]  ;;  %v2156_v56 = vor.u32 %v2853_v42, %v2153_v43 }
  0x5a   :  { %1388 = vmatpush.bf16.msra.mxu3 %v2620_v57  ;;  %v2409_v50 = vld [vmem:[#allocation3 + $0x410] sm:$0xf0]  ;;  %v2949_v51 = vld [vmem:[#allocation3 + $0x504] sm:$0xf]  ;;  %v2852_v57 = vld [vmem:[#allocation3 + $0x1f4] sm:$0xf0]  ;;  %v2284_v60 = vor.u32 %v2885_v46, %v2281_v47 }
  0x5b   :  { %1350 = vmatpush.bf16.msra.mxu0 %v2220_v63  ;;  %v2537_v52 = vld [vmem:[#allocation3 + $0x510] sm:$0xf0]  ;;  %v2412_v61 = vor.u32 %v2917_v48, %v2409_v50  ;;  %v2916_v63 = vld [vmem:[#allocation3 + $0x3f4] sm:$0xf0]  ;;  %v2144_v2 = vor.u32 %v2852_v57, %v2143_v55  ;;  %v2095_v34 = vld [vmem:[#allocation3 + $0x188] sm:$0xf] }
  0x5c   :  { %1363 = vmatpush.bf16.msra.mxu1 %v2348_v0  ;;  %v2540_v0 = vor.u32 %v2949_v51, %v2537_v52  ;;  %v2400_v7 = vor.u32 %v2916_v63, %v2399_v62  ;;  %v2840_v37 = vld [vmem:[#allocation3 + $0x194] sm:$0xf0]  ;;  %v2223_v39 = vld [vmem:[#allocation3 + $0x288] sm:$0xf] }
  0x5d   :  { %1376 = vmatpush.bf16.msra.mxu2 %v2476_v1  ;;  %v2016_v1 = vor.u32 %v2820_v54, %v2015_v53  ;;  %v2872_v40 = vld [vmem:[#allocation3 + $0x294] sm:$0xf0]  ;;  %v1951_v46 = vld [vmem:[#allocation3 + $0x68] sm:$0xf] }
  0x5e   :  { %1389 = vmatpush.bf16.msra.mxu3 %v2604_v5  ;;  %v2816_v5 = vld [vmem:[#allocation3 + $0xd4] sm:$0xf0]  ;;  %v2079_v48 = vld [vmem:[#allocation3 + $0x168] sm:$0xf] }
  0x5f   :  { %1351 = vmatpush.bf16.msra.mxu0 %v2204_v11  ;;  %v2383_v11 = vld [vmem:[#allocation3 + $0x3c8] sm:$0xf]  ;;  %v2904_v42 = vld [vmem:[#allocation3 + $0x394] sm:$0xf0] }
  0x60   :  { %1364 = vmatpush.bf16.msra.mxu1 %v2332_v12  ;;  %v2912_v12 = vld [vmem:[#allocation3 + $0x3d4] sm:$0xf0]  ;;  %v2207_v51 = vld [vmem:[#allocation3 + $0x268] sm:$0xf] }
  0x61   :  { %1377 = vmatpush.bf16.msra.mxu2 %v2460_v13  ;;  %v2000_v13 = vor.u32 %v2816_v5, %v1999_v4  ;;  %v2384_v23 = vor.u32 %v2912_v12, %v2383_v11  ;;  %v2804_v47 = vld [vmem:[#allocation3 + $0x74] sm:$0xf0]  ;;  %v2335_v53 = vld [vmem:[#allocation3 + $0x368] sm:$0xf] }
  0x62   :  { %1390 = vmatpush.bf16.msra.mxu3 %v2588_v17  ;;  %v2812_v17 = vld [vmem:[#allocation3 + $0xb4] sm:$0xf0]  ;;  %v1952_v55 = vor.u32 %v2804_v47, %v1951_v46  ;;  %v1935_v58 = vld [vmem:[#allocation3 + $0x48] sm:$0xf] }
  0x63   :  { %1352 = vmatpush.bf16.msra.mxu0 %v2188_v27  ;;  %v2367_v27 = vld [vmem:[#allocation3 + $0x3a8] sm:$0xf]  ;;  %v2836_v50 = vld [vmem:[#allocation3 + $0x174] sm:$0xf0] }
  0x64   :  { %1365 = vmatpush.bf16.msra.mxu1 %v2316_v28  ;;  %v2908_v28 = vld [vmem:[#allocation3 + $0x3b4] sm:$0xf0]  ;;  %v2191_v63 = vld [vmem:[#allocation3 + $0x248] sm:$0xf] }
  0x65   :  { %1378 = vmatpush.bf16.msra.mxu2 %v2444_v29  ;;  %v1984_v29 = vor.u32 %v2812_v17, %v1983_v16  ;;  %v2368_v36 = vor.u32 %v2908_v28, %v2367_v27  ;;  %v2868_v52 = vld [vmem:[#allocation3 + $0x274] sm:$0xf0]  ;;  %v1919_v6 = vld [vmem:[#allocation3 + $0x28] sm:$0xf] }
  0x66   :  { %1391 = vmatpush.bf16.msra.mxu3 %v2572_v33  ;;  %v2808_v33 = vld [vmem:[#allocation3 + $0x94] sm:$0xf0]  ;;  %v2208_v57 = vor.u32 %v2868_v52, %v2207_v51  ;;  %v2047_v8 = vld [vmem:[#allocation3 + $0x128] sm:$0xf] }
  0x67   :  { %1353 = vmatpush.bf16.msra.mxu0 %v2172_v41  ;;  %v2351_v41 = vld [vmem:[#allocation3 + $0x388] sm:$0xf]  ;;  %v1968_v43 = vor.u32 %v2808_v33, %v1967_v32  ;;  %v2900_v54 = vld [vmem:[#allocation3 + $0x374] sm:$0xf0] }
  0x68   :  { %1366 = vmatpush.bf16.msra.mxu1 %v2300_v44  ;;  %v2096_v44 = vor.u32 %v2840_v37, %v2095_v34  ;;  %v2800_v59 = vld [vmem:[#allocation3 + $0x54] sm:$0xf0]  ;;  %v2175_v11 = vld [vmem:[#allocation3 + $0x228] sm:$0xf]  ;;  %v2818_v37 = vld [vmem:[#allocation3 + $0xec] sm:$0xf] }
  0x69   :  { %1379 = vmatpush.bf16.msra.mxu2 %v2428_v45  ;;  %v2224_v45 = vor.u32 %v2872_v40, %v2223_v39  ;;  %v2832_v62 = vld [vmem:[#allocation3 + $0x154] sm:$0xf0]  ;;  %v1903_v16 = vld [vmem:[#allocation3 + $0x8] sm:$0xf]  ;;  %v2017_v39 = vld [vmem:[#allocation3 + $0xf8] sm:$0xf0] }
  0x6a   :  { %1392 = vmatpush.bf16.msra.mxu3 %v2556_v49  ;;  %v2352_v49 = vor.u32 %v2904_v42, %v2351_v41  ;;  %v2828_v10 = vld [vmem:[#allocation3 + $0x134] sm:$0xf0]  ;;  %v2031_v24 = vld [vmem:[#allocation3 + $0x108] sm:$0xf]  ;;  %v2850_v42 = vld [vmem:[#allocation3 + $0x1ec] sm:$0xf]  ;;  %v2020_v47 = vor.u32 %v2818_v37, %v2017_v39 }
  0x6b   :  { %1354 = vmatpush.bf16.msra.mxu0 %v2156_v56  ;;  %v2080_v56 = vor.u32 %v2836_v50, %v2079_v48  ;;  %v2860_v12 = vld [vmem:[#allocation3 + $0x234] sm:$0xf0]  ;;  %v2048_v21 = vor.u32 %v2828_v10, %v2047_v8  ;;  %v2159_v26 = vld [vmem:[#allocation3 + $0x208] sm:$0xf] }
  0x6c   :  { %1367 = vmatpush.bf16.msra.mxu1 %v2284_v60  ;;  %v2063_v60 = vld [vmem:[#allocation3 + $0x148] sm:$0xf]  ;;  %v2792_v17 = vld [vmem:[#allocation3 + $0x14] sm:$0xf0] }
  0x6d   :  { %1380 = vmatpush.bf16.msra.mxu2 %v2412_v61  ;;  %v2336_v61 = vor.u32 %v2900_v54, %v2335_v53  ;;  %v2064_v4 = vor.u32 %v2832_v62, %v2063_v60  ;;  %v2824_v25 = vld [vmem:[#allocation3 + $0x114] sm:$0xf0]  ;;  %v2655_v33 = vld [vmem:[#allocation3 + $0x5e8] sm:$0xf]  ;;  %v1904_v34 = vor.u32 %v2792_v17, %v1903_v16  ;;  %v2814_v53 = vld [vmem:[#allocation3 + $0xcc] sm:$0xf] }
  0x6e   :  { %1393 = vmatpush.bf16.msra.mxu3 %v2540_v0  ;;  %1355 = vmatmul.bf16.vlgmr.msra.gmra.mxu0 %v3117_v19  ;;  %v2864_v0 = vld [vmem:[#allocation3 + $0x254] sm:$0xf0]  ;;  %v2032_v40 = vor.u32 %v2824_v25, %v2031_v24  ;;  %v2511_v48 = vld [vmem:[#allocation3 + $0x4c8] sm:$0xf]  ;;  %v2001_v54 = vld [vmem:[#allocation3 + $0xd8] sm:$0xf0] }
  0x6f   :  { %1399 = vmatpush.bf16.msrb.mxu0 %v2016_v1  ;;  %1368 = vmatmul.bf16.vlgmr.msra.gmra.mxu1 %v3121_v22  ;;  %v2319_v1 = vld [vmem:[#allocation3 + $0x348] sm:$0xf]  ;;  %v2192_v5 = vor.u32 %v2864_v0, %v2191_v63  ;;  %v2856_v28 = vld [vmem:[#allocation3 + $0x214] sm:$0xf0]  ;;  %v2097_v16 = vld [vmem:[#allocation3 + $0x198] sm:$0xf0] }
  0x70   :  { %1412 = vmatpush.bf16.msrb.mxu1 %v2144_v2  ;;  %1381 = vmatmul.bf16.vlgmr.msra.gmra.mxu2 %v3130_v35  ;;  %v2896_v2 = vld [vmem:[#allocation3 + $0x354] sm:$0xf0]  ;;  %v2160_v41 = vor.u32 %v2856_v28, %v2159_v26  ;;  %v2639_v50 = vld [vmem:[#allocation3 + $0x5c8] sm:$0xf] }
  0x71   :  { %1425 = vmatpush.bf16.msrb.mxu2 %v2272_v3  ;;  %1394 = vmatmul.bf16.vlgmr.msra.gmra.mxu3 %v3132_v38  ;;  %v1936_v3 = vor.u32 %v2800_v59, %v1935_v58  ;;  %v2320_v9 = vor.u32 %v2896_v2, %v2319_v1  ;;  %v2948_v32 = vld [vmem:[#allocation3 + $0x4f4] sm:$0xf0]  ;;  %v2004_v59 = vor.u32 %v2814_v53, %v2001_v54  ;;  %v2495_v60 = vld [vmem:[#allocation3 + $0x4a8] sm:$0xf]  ;;  %v2810_v1 = vld [vmem:[#allocation3 + $0xac] sm:$0xf] }
  0x72   :  { %1438 = vmatpush.bf16.msrb.mxu3 %v2400_v7  ;;  %v2796_v7 = vld [vmem:[#allocation3 + $0x34] sm:$0xf0]  ;;  %v2623_v62 = vld [vmem:[#allocation3 + $0x5a8] sm:$0xf]  ;;  %v1985_v2 = vld [vmem:[#allocation3 + $0xb8] sm:$0xf0] }
  0x73   :  { %1400 = vmatpush.bf16.msrb.mxu0 %v2000_v13  ;;  %v2303_v13 = vld [vmem:[#allocation3 + $0x328] sm:$0xf]  ;;  %v2976_v52 = vld [vmem:[#allocation3 + $0x5d4] sm:$0xf0] }
  0x74   :  { %1413 = vmatpush.bf16.msrb.mxu1 %v2128_v14  ;;  %v2892_v14 = vld [vmem:[#allocation3 + $0x334] sm:$0xf0]  ;;  %v2640_v58 = vor.u32 %v2976_v52, %v2639_v50  ;;  %v2479_v8 = vld [vmem:[#allocation3 + $0x488] sm:$0xf] }
  0x75   :  { %1426 = vmatpush.bf16.msrb.mxu2 %v2256_v15  ;;  %v1920_v15 = vor.u32 %v2796_v7, %v1919_v6  ;;  %v2304_v27 = vor.u32 %v2892_v14, %v2303_v13  ;;  %v2972_v0 = vld [vmem:[#allocation3 + $0x5b4] sm:$0xf0]  ;;  %v1988_v7 = vor.u32 %v2810_v1, %v1985_v2  ;;  %v2607_v10 = vld [vmem:[#allocation3 + $0x588] sm:$0xf]  ;;  %v2806_v13 = vld [vmem:[#allocation3 + $0x8c] sm:$0xf] }
  0x76   :  { %1439 = vmatpush.bf16.msrb.mxu3 %v2384_v23  ;;  %v2176_v23 = vor.u32 %v2860_v12, %v2175_v11  ;;  %v2624_v6 = vor.u32 %v2972_v0, %v2623_v62  ;;  %v2968_v12 = vld [vmem:[#allocation3 + $0x594] sm:$0xf0]  ;;  %v1969_v14 = vld [vmem:[#allocation3 + $0x98] sm:$0xf0]  ;;  %v2463_v24 = vld [vmem:[#allocation3 + $0x468] sm:$0xf] }
  0x77   :  { %1401 = vmatpush.bf16.msrb.mxu0 %v1984_v29  ;;  %v2287_v29 = vld [vmem:[#allocation3 + $0x308] sm:$0xf]  ;;  %v2932_v25 = vld [vmem:[#allocation3 + $0x474] sm:$0xf0]  ;;  %v2790_v2 = vld [vmem:[#allocation3 + $0xc] sm:$0xf] }
  0x78   :  { %1414 = vmatpush.bf16.msrb.mxu1 %v2112_v30  ;;  %v2888_v30 = vld [vmem:[#allocation3 + $0x314] sm:$0xf0]  ;;  %v2591_v26 = vld [vmem:[#allocation3 + $0x568] sm:$0xf] }
  0x79   :  { %1427 = vmatpush.bf16.msrb.mxu2 %v2240_v31  ;;  %v2527_v31 = vld [vmem:[#allocation3 + $0x4e8] sm:$0xf]  ;;  %v2964_v28 = vld [vmem:[#allocation3 + $0x574] sm:$0xf0] }
  0x7a   :  { %1440 = vmatpush.bf16.msrb.mxu3 %v2368_v36  ;;  %v2980_v36 = vld [vmem:[#allocation3 + $0x5f4] sm:$0xf0]  ;;  %v2447_v37 = vld [vmem:[#allocation3 + $0x448] sm:$0xf] }
  0x7b   :  { %1402 = vmatpush.bf16.msrb.mxu0 %v1968_v43  ;;  %v2145_v43 = vld [vmem:[#allocation3 + $0x1f8] sm:$0xf0]  ;;  %v2656_v46 = vor.u32 %v2980_v36, %v2655_v33  ;;  %v2464_v33 = vor.u32 %v2932_v25, %v2463_v24  ;;  %v2928_v39 = vld [vmem:[#allocation3 + $0x454] sm:$0xf0]  ;;  %v2431_v50 = vld [vmem:[#allocation3 + $0x428] sm:$0xf] }
  0x7c   :  { %1415 = vmatpush.bf16.msrb.mxu1 %v2096_v44  ;;  %v2288_v44 = vor.u32 %v2888_v30, %v2287_v29  ;;  %v2148_v51 = vor.u32 %v2850_v42, %v2145_v43  ;;  %v2802_v29 = vld [vmem:[#allocation3 + $0x6c] sm:$0xf]  ;;  %v1953_v30 = vld [vmem:[#allocation3 + $0x78] sm:$0xf0]  ;;  %v2960_v42 = vld [vmem:[#allocation3 + $0x554] sm:$0xf0] }
  0x7d   :  { %1428 = vmatpush.bf16.msrb.mxu2 %v2224_v45  ;;  %v2528_v45 = vor.u32 %v2948_v32, %v2527_v31  ;;  %v2834_v31 = vld [vmem:[#allocation3 + $0x16c] sm:$0xf]  ;;  %v2081_v32 = vld [vmem:[#allocation3 + $0x178] sm:$0xf0]  ;;  %v1956_v36 = vor.u32 %v2802_v29, %v1953_v30  ;;  %v2559_v52 = vld [vmem:[#allocation3 + $0x528] sm:$0xf] }
  0x7e   :  { %1441 = vmatpush.bf16.msrb.mxu3 %v2352_v49  ;;  %v2944_v49 = vld [vmem:[#allocation3 + $0x4d4] sm:$0xf0]  ;;  %v2798_v43 = vld [vmem:[#allocation3 + $0x4c] sm:$0xf]  ;;  %v2543_v0 = vld [vmem:[#allocation3 + $0x508] sm:$0xf] }
  0x7f   :  { %1403 = vmatpush.bf16.msrb.mxu0 %v1952_v55  ;;  %v2846_v55 = vld [vmem:[#allocation3 + $0x1cc] sm:$0xf]  ;;  %v2956_v54 = vld [vmem:[#allocation3 + $0x534] sm:$0xf0]  ;;  %v2385_v30 = vld [vmem:[#allocation3 + $0x3d8] sm:$0xf0] }
  0x80   :  { %1416 = vmatpush.bf16.msrb.mxu1 %v2080_v56  ;;  %v2129_v56 = vld [vmem:[#allocation3 + $0x1d8] sm:$0xf0]  ;;  %v2560_v62 = vor.u32 %v2956_v54, %v2559_v52  ;;  %v2952_v1 = vld [vmem:[#allocation3 + $0x514] sm:$0xf0]  ;;  %v2870_v52 = vld [vmem:[#allocation3 + $0x28c] sm:$0xf] }
  0x81   :  { %1429 = vmatpush.bf16.msrb.mxu2 %v2208_v57  ;;  %v2512_v57 = vor.u32 %v2944_v49, %v2511_v48  ;;  %v2132_v63 = vor.u32 %v2846_v55, %v2129_v56  ;;  %v2794_v55 = vld [vmem:[#allocation3 + $0x2c] sm:$0xf]  ;;  %v1921_v56 = vld [vmem:[#allocation3 + $0x38] sm:$0xf0] }
  0x82   :  { %1442 = vmatpush.bf16.msrb.mxu3 %v2336_v61  ;;  %v2940_v61 = vld [vmem:[#allocation3 + $0x4b4] sm:$0xf0]  ;;  %v2902_v54 = vld [vmem:[#allocation3 + $0x38c] sm:$0xf] }
  0x83   :  { %1404 = vmatpush.bf16.msrb.mxu0 %v1936_v3  ;;  %v2842_v3 = vld [vmem:[#allocation3 + $0x1ac] sm:$0xf] }
  0x84   :  { %1417 = vmatpush.bf16.msrb.mxu1 %v2064_v4  ;;  %v2113_v4 = vld [vmem:[#allocation3 + $0x1b8] sm:$0xf0] }
  0x85   :  { %1430 = vmatpush.bf16.msrb.mxu2 %v2192_v5  ;;  %v2496_v5 = vor.u32 %v2940_v61, %v2495_v60  ;;  %v2116_v11 = vor.u32 %v2842_v3, %v2113_v4  ;;  %v2415_v60 = vld [vmem:[#allocation3 + $0x408] sm:$0xf]  ;;  %v2920_v61 = vld [vmem:[#allocation3 + $0x414] sm:$0xf0]  ;;  %v1905_v4 = vld [vmem:[#allocation3 + $0x18] sm:$0xf0] }
  0x86   :  { %1443 = vmatpush.bf16.msrb.mxu3 %v2320_v9  ;;  %v2936_v9 = vld [vmem:[#allocation3 + $0x494] sm:$0xf0] }
  0x87   :  { %1405 = vmatpush.bf16.msrb.mxu0 %v1920_v15  ;;  %v2838_v15 = vld [vmem:[#allocation3 + $0x18c] sm:$0xf]  ;;  %v2480_v17 = vor.u32 %v2936_v9, %v2479_v8  ;;  %v2273_v8 = vld [vmem:[#allocation3 + $0x2f8] sm:$0xf0] }
  0x88   :  { %1418 = vmatpush.bf16.msrb.mxu1 %v2048_v21  ;;  %v2608_v21 = vor.u32 %v2968_v12, %v2607_v10  ;;  %v2914_v9 = vld [vmem:[#allocation3 + $0x3ec] sm:$0xf]  ;;  %v2416_v10 = vor.u32 %v2920_v61, %v2415_v60 }
  0x89   :  { %1431 = vmatpush.bf16.msrb.mxu2 %v2176_v23  ;;  %v1972_v23 = vor.u32 %v2806_v13, %v1969_v14  ;;  %v2946_v12 = vld [vmem:[#allocation3 + $0x4ec] sm:$0xf]  ;;  %v2529_v13 = vld [vmem:[#allocation3 + $0x4f8] sm:$0xf0]  ;;  %v2544_v14 = vor.u32 %v2952_v1, %v2543_v0 }
  0x8a   :  { %1444 = vmatpush.bf16.msrb.mxu3 %v2304_v27  ;;  %v2100_v27 = vor.u32 %v2838_v15, %v2097_v16  ;;  %v1908_v15 = vor.u32 %v2790_v2, %v1905_v4  ;;  %v2978_v16 = vld [vmem:[#allocation3 + $0x5ec] sm:$0xf]  ;;  %v2532_v25 = vor.u32 %v2946_v12, %v2529_v13  ;;  %v2337_v2 = vld [vmem:[#allocation3 + $0x378] sm:$0xf0] }
  0x8b   :  { %1406 = vmatpush.bf16.msrb.mxu0 %v1904_v34  ;;  %v2592_v34 = vor.u32 %v2964_v28, %v2591_v26  ;;  %v2878_v26 = vld [vmem:[#allocation3 + $0x2cc] sm:$0xf]  ;;  %v2465_v4 = vld [vmem:[#allocation3 + $0x478] sm:$0xf0] }
  0x8c   :  { %1419 = vmatpush.bf16.msrb.mxu1 %v2032_v40  ;;  %v2575_v40 = vld [vmem:[#allocation3 + $0x548] sm:$0xf]  ;;  %v2910_v28 = vld [vmem:[#allocation3 + $0x3cc] sm:$0xf] }
  0x8d   :  { %1432 = vmatpush.bf16.msrb.mxu2 %v2160_v41  ;;  %v2084_v41 = vor.u32 %v2834_v31, %v2081_v32  ;;  %v2576_v48 = vor.u32 %v2960_v42, %v2575_v40  ;;  %v2942_v31 = vld [vmem:[#allocation3 + $0x4cc] sm:$0xf]  ;;  %v2513_v32 = vld [vmem:[#allocation3 + $0x4d8] sm:$0xf0] }
  0x8e   :  { %1445 = vmatpush.bf16.msrb.mxu3 %v2288_v44  ;;  %1407 = vmatmul.bf16.vlgmr.msrb.gmra.mxu0 %v3115_v18  ;;  %v1937_v44 = vld [vmem:[#allocation3 + $0x58] sm:$0xf0]  ;;  %v2874_v40 = vld [vmem:[#allocation3 + $0x2ac] sm:$0xf] }
  0x8f   :  { %1451 = vmatpush.bf16.msra.mxu0 %v2528_v45  ;;  %1420 = vmatmul.bf16.vlgmr.msrb.gmra.mxu1 %v3119_v20  ;;  %v2830_v45 = vld [vmem:[#allocation3 + $0x14c] sm:$0xf]  ;;  %v1940_v49 = vor.u32 %v2798_v43, %v1937_v44  ;;  %v2369_v44 = vld [vmem:[#allocation3 + $0x3b8] sm:$0xf0] }
  0x90   :  { %1464 = vmatpush.bf16.msra.mxu1 %v2656_v46  ;;  %1433 = vmatmul.bf16.vlgmr.msrb.gmra.mxu2 %v3117_v19  ;;  %v2065_v46 = vld [vmem:[#allocation3 + $0x158] sm:$0xf0]  ;;  %v2906_v42 = vld [vmem:[#allocation3 + $0x3ac] sm:$0xf] }
  0x91   :  { %1477 = vmatpush.bf16.msra.mxu2 %v2020_v47  ;;  %1446 = vmatmul.bf16.vlgmr.msrb.gmra.mxu3 %v3121_v22  ;;  %v2448_v47 = vor.u32 %v2928_v39, %v2447_v37  ;;  %v2068_v53 = vor.u32 %v2830_v45, %v2065_v46  ;;  %v2388_v37 = vor.u32 %v2910_v28, %v2385_v30  ;;  %v2938_v45 = vld [vmem:[#allocation3 + $0x4ac] sm:$0xf]  ;;  %v2497_v46 = vld [vmem:[#allocation3 + $0x4b8] sm:$0xf0] }
  0x92   :  { %1490 = vmatpush.bf16.msra.mxu3 %v2148_v51  ;;  %v2924_v51 = vld [vmem:[#allocation3 + $0x434] sm:$0xf0]  ;;  %v2516_v39 = vor.u32 %v2942_v31, %v2513_v32  ;;  %v2898_v0 = vld [vmem:[#allocation3 + $0x36c] sm:$0xf]  ;;  %v2305_v32 = vld [vmem:[#allocation3 + $0x338] sm:$0xf0] }
  0x93   :  { %1452 = vmatpush.bf16.msra.mxu0 %v2512_v57  ;;  %v2826_v57 = vld [vmem:[#allocation3 + $0x12c] sm:$0xf] }
  0x94   :  { %1465 = vmatpush.bf16.msra.mxu1 %v2640_v58  ;;  %v2049_v58 = vld [vmem:[#allocation3 + $0x138] sm:$0xf0]  ;;  %v2894_v12 = vld [vmem:[#allocation3 + $0x34c] sm:$0xf] }
  0x95   :  { %1478 = vmatpush.bf16.msra.mxu2 %v2004_v59  ;;  %v2432_v59 = vor.u32 %v2924_v51, %v2431_v50  ;;  %v2052_v3 = vor.u32 %v2826_v57, %v2049_v58  ;;  %v2372_v50 = vor.u32 %v2906_v42, %v2369_v44  ;;  %v2500_v51 = vor.u32 %v2938_v45, %v2497_v46  ;;  %v2934_v57 = vld [vmem:[#allocation3 + $0x48c] sm:$0xf]  ;;  %v2481_v58 = vld [vmem:[#allocation3 + $0x498] sm:$0xf0] }
  0x96   :  { %1491 = vmatpush.bf16.msra.mxu3 %v2132_v63  ;;  %v1924_v63 = vor.u32 %v2794_v55, %v1921_v56  ;;  %v2353_v56 = vld [vmem:[#allocation3 + $0x398] sm:$0xf0]  ;;  %v2858_v28 = vld [vmem:[#allocation3 + $0x22c] sm:$0xf] }
  0x97   :  { %1453 = vmatpush.bf16.msra.mxu0 %v2496_v5  ;;  %v2822_v5 = vld [vmem:[#allocation3 + $0x10c] sm:$0xf]  ;;  %v2356_v61 = vor.u32 %v2902_v54, %v2353_v56  ;;  %v2289_v46 = vld [vmem:[#allocation3 + $0x318] sm:$0xf0] }
  0x98   :  { %1466 = vmatpush.bf16.msra.mxu1 %v2624_v6  ;;  %v2033_v6 = vld [vmem:[#allocation3 + $0x118] sm:$0xf0]  ;;  %v2890_v30 = vld [vmem:[#allocation3 + $0x32c] sm:$0xf] }
  0x99   :  { %1479 = vmatpush.bf16.msra.mxu2 %v1988_v7  ;;  %v2882_v7 = vld [vmem:[#allocation3 + $0x2ec] sm:$0xf] }
  0x9a   :  { %1492 = vmatpush.bf16.msra.mxu3 %v2116_v11  ;;  %v2401_v11 = vld [vmem:[#allocation3 + $0x3f8] sm:$0xf0]  ;;  %v2854_v42 = vld [vmem:[#allocation3 + $0x20c] sm:$0xf] }
  0x9b   :  { %1454 = vmatpush.bf16.msra.mxu0 %v2480_v17  ;;  %v2657_v17 = vld [vmem:[#allocation3 + $0x5f8] sm:$0xf0]  ;;  %v2404_v24 = vor.u32 %v2914_v9, %v2401_v11  ;;  %v2886_v44 = vld [vmem:[#allocation3 + $0x30c] sm:$0xf] }
  0x9c   :  { %1467 = vmatpush.bf16.msra.mxu1 %v2608_v21  ;;  %v2036_v21 = vor.u32 %v2822_v5, %v2033_v6  ;;  %v2660_v29 = vor.u32 %v2978_v16, %v2657_v17  ;;  %v2962_v5 = vld [vmem:[#allocation3 + $0x56c] sm:$0xf]  ;;  %v2593_v6 = vld [vmem:[#allocation3 + $0x578] sm:$0xf0]  ;;  %v2292_v56 = vor.u32 %v2886_v44, %v2289_v46 }
  0x9d   :  { %1480 = vmatpush.bf16.msra.mxu2 %v1972_v23  ;;  %v2276_v23 = vor.u32 %v2882_v7, %v2273_v8  ;;  %v2340_v8 = vor.u32 %v2898_v0, %v2337_v2  ;;  %v2193_v11 = vld [vmem:[#allocation3 + $0x258] sm:$0xf0]  ;;  %v2596_v13 = vor.u32 %v2962_v5, %v2593_v6  ;;  %v2958_v17 = vld [vmem:[#allocation3 + $0x54c] sm:$0xf]  ;;  %v2985_v2 = vld [vmem:[#allocation5 + $0x20] sm:$0xff] }
  0x9e   :  { %1493 = vmatpush.bf16.msra.mxu3 %v2100_v27  ;;  %v2257_v27 = vld [vmem:[#allocation3 + $0x2d8] sm:$0xf0]  ;;  %v2994_v0 = vld [vmem:[#allocation5 + $0x68] sm:$0xff] }
  0x9f   :  { %1455 = vmatpush.bf16.msra.mxu0 %v2464_v33  ;;  %v2974_v33 = vld [vmem:[#allocation3 + $0x5cc] sm:$0xf]  ;;  %v2449_v16 = vld [vmem:[#allocation3 + $0x458] sm:$0xf0] }
  0xa0   :  { %1468 = vmatpush.bf16.msra.mxu1 %v2592_v34  ;;  %v2641_v34 = vld [vmem:[#allocation3 + $0x5d8] sm:$0xf0] }
  0xa1   :  { %1481 = vmatpush.bf16.msra.mxu2 %v1956_v36  ;;  %v2260_v36 = vor.u32 %v2878_v26, %v2257_v27  ;;  %v2644_v43 = vor.u32 %v2974_v33, %v2641_v34  ;;  %v2922_v33 = vld [vmem:[#allocation3 + $0x42c] sm:$0xf]  ;;  %v2433_v34 = vld [vmem:[#allocation3 + $0x438] sm:$0xf0] }
  0xa2   :  { %1494 = vmatpush.bf16.msra.mxu3 %v2084_v41  ;;  %v2241_v41 = vld [vmem:[#allocation3 + $0x2b8] sm:$0xf0] }
  0xa3   :  { %1456 = vmatpush.bf16.msra.mxu0 %v2448_v47  ;;  %v2970_v47 = vld [vmem:[#allocation3 + $0x5ac] sm:$0xf]  ;;  %v2984_v5 = vld [vmem:[#allocation5 + $0x18] sm:$0xff] }
  0xa4   :  { %1469 = vmatpush.bf16.msra.mxu1 %v2576_v48  ;;  %v2625_v48 = vld [vmem:[#allocation3 + $0x5b8] sm:$0xf0] }
  0xa5   :  { %1482 = vmatpush.bf16.msra.mxu2 %v1940_v49  ;;  %v2244_v49 = vor.u32 %v2874_v40, %v2241_v41  ;;  %v2628_v55 = vor.u32 %v2970_v47, %v2625_v48  ;;  %v2308_v40 = vor.u32 %v2890_v30, %v2305_v32  ;;  %v2436_v41 = vor.u32 %v2922_v33, %v2433_v34  ;;  %v2918_v47 = vld [vmem:[#allocation3 + $0x40c] sm:$0xf]  ;;  %v2417_v48 = vld [vmem:[#allocation3 + $0x418] sm:$0xf0] }
  0xa6   :  { %1495 = vmatpush.bf16.msra.mxu3 %v2068_v53  ;;  %v2225_v53 = vld [vmem:[#allocation3 + $0x298] sm:$0xf0] }
  0xa7   :  { %1457 = vmatpush.bf16.msra.mxu0 %v2432_v59  ;;  %v2966_v59 = vld [vmem:[#allocation3 + $0x58c] sm:$0xf]  ;;  %v2228_v60 = vor.u32 %v2870_v52, %v2225_v53 }
  0xa8   :  { %1470 = vmatpush.bf16.msra.mxu1 %v2560_v62  ;;  %v2866_v62 = vld [vmem:[#allocation3 + $0x26c] sm:$0xf] }
  0xa9   :  { %1483 = vmatpush.bf16.msra.mxu2 %v1924_v63  ;;  %v2209_v63 = vld [vmem:[#allocation3 + $0x278] sm:$0xf0] }
  0xaa   :  { %1496 = vmatpush.bf16.msra.mxu3 %v2052_v3  ;;  %v2930_v3 = vld [vmem:[#allocation3 + $0x46c] sm:$0xf]  ;;  %v2212_v7 = vor.u32 %v2866_v62, %v2209_v63  ;;  %v2995_v62 = vld [vmem:[#allocation5 + $0x70] sm:$0xff] }
  0xab   :  { %1458 = vmatpush.bf16.msra.mxu0 %v2416_v10  ;;  %v2468_v9 = vor.u32 %v2930_v3, %v2465_v4  ;;  %v2862_v10 = vld [vmem:[#allocation3 + $0x24c] sm:$0xf]  ;;  %v2993_v4 = vld [vmem:[#allocation5 + $0x60] sm:$0xff] }
  0xac   :  { %1471 = vmatpush.bf16.msra.mxu1 %v2544_v14  ;;  %v2321_v14 = vld [vmem:[#allocation3 + $0x358] sm:$0xf0]  ;;  %v2986_v63 = vld [vmem:[#allocation5 + $0x28] sm:$0xff] }
  0xad   :  { %1484 = vmatpush.bf16.msra.mxu2 %v1908_v15  ;;  %v2926_v15 = vld [vmem:[#allocation3 + $0x44c] sm:$0xf]  ;;  %v2324_v26 = vor.u32 %v2894_v12, %v2321_v14  ;;  %v3004_v12 = vld [vmem:[#allocation5 + $0xb8] sm:$0xff] }
  0xae   :  { %1497 = vmatpush.bf16.msra.mxu3 %v2036_v21  ;;  %1459 = vmatmul.bf16.vlgmr.msra.gmra.mxu0 %v3130_v35  ;;  %v2577_v21 = vld [vmem:[#allocation3 + $0x558] sm:$0xf0]  ;;  %v2452_v27 = vor.u32 %v2926_v15, %v2449_v16  ;;  %v2990_v15 = vld [vmem:[#allocation5 + $0x48] sm:$0xff]  ;;  %v3003_v16 = vld [vmem:[#allocation5 + $0xb0] sm:$0xff] }
  0xaf   :  { %1503 = vmatpush.bf16.msrb.mxu0 %v2276_v23  ;;  %1472 = vmatmul.bf16.vlgmr.msra.gmra.mxu1 %v3132_v38  ;;  %v2580_v31 = vor.u32 %v2958_v17, %v2577_v21 }
  0xb0   :  { %1516 = vmatpush.bf16.msrb.mxu1 %v2404_v24  ;;  %1485 = vmatmul.bf16.vlgmr.msra.gmra.mxu2 %v3115_v18  ;;  %v2609_v18 = vld [vmem:[#allocation3 + $0x598] sm:$0xf0]  ;;  %v2196_v24 = vor.u32 %v2862_v10, %v2193_v11  ;;  %v2991_v11 = vld [vmem:[#allocation5 + $0x50] sm:$0xff] }
  0xb1   :  { %1529 = vmatpush.bf16.msrb.mxu2 %v2532_v25  ;;  %1498 = vmatmul.bf16.vlgmr.msra.gmra.mxu3 %v3119_v20  ;;  %v2484_v20 = vor.u32 %v2934_v57, %v2481_v58  ;;  %v2612_v1 = vor.u32 %v2966_v59, %v2609_v18  ;;  %v2420_v57 = vor.u32 %v2918_v47, %v2417_v48  ;;  %v2988_v59 = vld [vmem:[#allocation5 + $0x38] sm:$0xff]  ;;  %v2998_v47 = vld [vmem:[#allocation5 + $0x88] sm:$0xff] }
  0xb2   :  { %1542 = vmatpush.bf16.msrb.mxu3 %v2660_v29  ;;  %v2177_v29 = vld [vmem:[#allocation3 + $0x238] sm:$0xf0] }
  0xb3   :  { %1504 = vmatpush.bf16.msrb.mxu0 %v2260_v36  ;;  %v2954_v36 = vld [vmem:[#allocation3 + $0x52c] sm:$0xf]  ;;  %v2996_v18 = vld [vmem:[#allocation5 + $0x78] sm:$0xff] }
  0xb4   :  { %1517 = vmatpush.bf16.msrb.mxu1 %v2388_v37  ;;  %v3152_v25 = vpop.f32.mrf.mxu1  ;;  %v2561_v37 = vld [vmem:[#allocation3 + $0x538] sm:$0xf0]  ;;  %v1291_v53 = vpop.f32.mrf.mxu3 }
  0xb5   :  { %1530 = vmatpush.bf16.msrb.mxu2 %v2516_v39  ;;  %v3150_v23 = vpop.f32.mrf.mxu0  ;;  %v2180_v39 = vor.u32 %v2858_v28, %v2177_v29  ;;  %v2564_v45 = vor.u32 %v2954_v36, %v2561_v37  ;;  %v3002_v28 = vld [vmem:[#allocation5 + $0xa8] sm:$0xff]  ;;  %v3001_v29 = vld [vmem:[#allocation5 + $0xa0] sm:$0xff]  ;;  %v3000_v36 = vld [vmem:[#allocation5 + $0x98] sm:$0xff] }
  0xb6   :  { %1543 = vmatpush.bf16.msrb.mxu3 %v2644_v43  ;;  %v2161_v43 = vld [vmem:[#allocation3 + $0x218] sm:$0xf0] }
  0xb7   :  { %1505 = vmatpush.bf16.msrb.mxu0 %v2244_v49  ;;  %v1278_v49 = vpop.f32.mrf.mxu2  ;;  %v2164_v54 = vor.u32 %v2854_v42, %v2161_v43 }
  0xb8   :  { %1518 = vmatpush.bf16.msrb.mxu1 %v2372_v50  ;;  %v2950_v50 = vld [vmem:[#allocation3 + $0x50c] sm:$0xf] }
  0xb9   :  { %1531 = vmatpush.bf16.msrb.mxu2 %v2500_v51  ;;  %v2545_v51 = vld [vmem:[#allocation3 + $0x518] sm:$0xf0] }
  0xba   :  { %1544 = vmatpush.bf16.msrb.mxu3 %v2628_v55  ;;  %v2548_v58 = vor.u32 %v2950_v50, %v2545_v51  ;;  %v2997_v50 = vld [vmem:[#allocation5 + $0x80] sm:$0xff]  ;;  %v3012_v51 = vld [vmem:[#allocation5 + $0xf8] sm:$0xff] }
  0xbb   :  { %1506 = vmatpush.bf16.msrb.mxu0 %v2228_v60  ;;  %v2987_v60 = vld [vmem:[#allocation5 + $0x30] sm:$0xff] }
  0xbc   :  { %1519 = vmatpush.bf16.msrb.mxu1 %v2356_v61  ;;  %v1267_v55 = vpop.f32.mrf.mxu1 }
  0xbd   :  { %1532 = vmatpush.bf16.msrb.mxu2 %v2484_v20  ;;  %v1254_v52 = vpop.f32.mrf.mxu0  ;;  %v1293_v20 = vpop.f32.mrf.mxu3 }
  0xbe   :  { %1545 = vmatpush.bf16.msrb.mxu3 %v2612_v1 }
  0xbf   :  { %1507 = vmatpush.bf16.msrb.mxu0 %v2212_v7  ;;  %v1280_v61 = vpop.f32.mrf.mxu2 }
  0xc0   :  { %1520 = vmatpush.bf16.msrb.mxu1 %v2340_v8  ;;  %v2983_v8 = vld [vmem:[#allocation5 + $0x10] sm:$0xff]  ;;  %v3008_v61 = vld [vmem:[#allocation5 + $0xd8] sm:$0xff] }
  0xc1   :  { %1533 = vmatpush.bf16.msrb.mxu2 %v2468_v9 }
  0xc2   :  { %1546 = vmatpush.bf16.msrb.mxu3 %v2596_v13  ;;  %v2982_v13 = vld [vmem:[#allocation5 + $0x8] sm:$0xff] }
  0xc3   :  { %1508 = vmatpush.bf16.msrb.mxu0 %v2196_v24 }
  0xc4   :  { %1521 = vmatpush.bf16.msrb.mxu1 %v2324_v26 }
  0xc5   :  { %1534 = vmatpush.bf16.msrb.mxu2 %v2452_v27 }
  0xc6   :  { %1547 = vmatpush.bf16.msrb.mxu3 %v2580_v31 }
  0xc7   :  { %1509 = vmatpush.bf16.msrb.mxu0 %v2180_v39 }
  0xc8   :  { %1522 = vmatpush.bf16.msrb.mxu1 %v2308_v40  ;;  %v2999_v40 = vld [vmem:[#allocation5 + $0x90] sm:$0xff] }
  0xc9   :  { %1535 = vmatpush.bf16.msrb.mxu2 %v2436_v41 }
  0xca   :  { %1548 = vmatpush.bf16.msrb.mxu3 %v2564_v45 }
  0xcb   :  { %1510 = vmatpush.bf16.msrb.mxu0 %v2164_v54  ;;  %v1304_v1 = vpop.f32.mrf.mxu0 }
  0xcc   :  { %1523 = vmatpush.bf16.msrb.mxu1 %v2292_v56  ;;  %v1317_v3 = vpop.f32.mrf.mxu1 }
  0xcd   :  { %1536 = vmatpush.bf16.msrb.mxu2 %v2420_v57  ;;  %v3010_v57 = vld [vmem:[#allocation5 + $0xe8] sm:$0xff] }
  0xce   :  { %1549 = vmatpush.bf16.msrb.mxu3 %v2548_v58  ;;  %1511 = vmatmul.bf16.vlgmr.msrb.gmra.mxu0 %v3117_v19  ;;  %v1266_v19 = vadd.f32 %v3152_v25, %v3150_v23  ;;  %v2981_v23 = vld [vmem:[#allocation5] sm:$0xff] }
  0xcf   :  { %1834 = vmatpush.bf16.msra.mxu0 %v2988_v59  ;;  %1524 = vmatmul.bf16.vlgmr.msrb.gmra.mxu1 %v3121_v22  ;;  %v2989_v25 = vld [vmem:[#allocation5 + $0x40] sm:$0xff] }
  0xd0   :  { %1847 = vmatpush.bf16.msra.mxu1 %v2996_v18  ;;  %1537 = vmatmul.bf16.vlgmr.msrb.gmra.mxu2 %v3130_v35  ;;  %v1279_v22 = vadd.f32 %v1278_v49, %v1266_v19  ;;  %v2992_v35 = vld [vmem:[#allocation5 + $0x58] sm:$0xff]  ;;  %v3009_v59 = vld [vmem:[#allocation5 + $0xe0] sm:$0xff]  ;;  %v3006_v19 = vld [vmem:[#allocation5 + $0xc8] sm:$0xff] }
  0xd1   :  { %1550 = vmatmul.bf16.vlgmr.msrb.gmra.mxu3 %v3132_v38  ;;  %1860 = vmatpush.bf16.msra.mxu2 %v3004_v12 }
  0xd2   :  { %v1292_v10 = vadd.f32 %v1291_v53, %v1279_v22  ;;  %1873 = vmatpush.bf16.msra.mxu3 %v3012_v51  ;;  %v3011_v53 = vld [vmem:[#allocation5 + $0xf0] sm:$0xff]  ;;  %v3005_v22 = vld [vmem:[#allocation5 + $0xc0] sm:$0xff] }
  0xd3   :  { %1835 = vmatpush.bf16.msra.mxu0 %v2987_v60  ;;  %v1330_v6 = vpop.f32.mrf.mxu2  ;;  %v1306_v7 = vpop.f32.mrf.mxu0 }
  0xd4   :  { %1848 = vmatpush.bf16.msra.mxu1 %v2995_v62  ;;  %v1343_v38 = vpop.f32.mrf.mxu3  ;;  %v1319_v9 = vpop.f32.mrf.mxu1  ;;  %v1305_v14 = vadd.f32 %v1304_v1, %v1292_v10 }
  0xd5   :  { %1861 = vmatpush.bf16.msra.mxu2 %v3003_v16  ;;  %v1344_v27 = vadd.f32 %v1343_v38, %v1330_v6 }
  0xd6   :  { %v1318_v24 = vadd.f32 %v1317_v3, %v1305_v14  ;;  %1874 = vmatpush.bf16.msra.mxu3 %v3011_v53 }
  0xd7   :  { %1836 = vmatpush.bf16.msra.mxu0 %v2986_v63  ;;  %v3007_v63 = vld [vmem:[#allocation5 + $0xd0] sm:$0xff] }
  0xd8   :  { %1849 = vmatpush.bf16.msra.mxu1 %v2994_v0  ;;  %v1570_v26 = vpack.c.bf16 %v1318_v24, %v1318_v24 }
  0xd9   :  { %1862 = vmatpush.bf16.msra.mxu2 %v3002_v28 }
  0xda   :  { %1875 = vmatpush.bf16.msra.mxu3 %v3010_v57 }
  0xdb   :  { %1837 = vmatpush.bf16.msra.mxu0 %v2985_v2  ;;  %v1332_v17 = vpop.f32.mrf.mxu2 }
  0xdc   :  { %1850 = vmatpush.bf16.msra.mxu1 %v2993_v4  ;;  %v1345_v21 = vpop.f32.mrf.mxu3 }
  0xdd   :  { %1863 = vmatpush.bf16.msra.mxu2 %v3001_v29  ;;  %v3019_v29 = vld [vmem:[%s3169_s3] ss:$0 sm:$0xff] }
  0xde   :  { %1876 = vmatpush.bf16.msra.mxu3 %v3009_v59 }
  0xdf   :  { %1838 = vmatpush.bf16.msra.mxu0 %v2984_v5 }
  0xe0   :  { %1851 = vmatpush.bf16.msra.mxu1 %v2992_v35 }
  0xe1   :  { %1864 = vmatpush.bf16.msra.mxu2 %v3000_v36 }
  0xe2   :  { %1877 = vmatpush.bf16.msra.mxu3 %v3008_v61 }
  0xe3   :  { %1839 = vmatpush.bf16.msra.mxu0 %v2983_v8 }
  0xe4   :  { %1852 = vmatpush.bf16.msra.mxu1 %v2991_v11 }
  0xe5   :  { %1865 = vmatpush.bf16.msra.mxu2 %v2999_v40 }
  0xe6   :  { %1878 = vmatpush.bf16.msra.mxu3 %v3007_v63 }
  0xe7   :  { %1840 = vmatpush.bf16.msra.mxu0 %v2982_v13 }
  0xe8   :  { %1853 = vmatpush.bf16.msra.mxu1 %v2990_v15 }
  0xe9   :  { %1866 = vmatpush.bf16.msra.mxu2 %v2998_v47 }
  0xea   :  { %1879 = vmatpush.bf16.msra.mxu3 %v3006_v19 }
  0xeb   :  { %1841 = vmatpush.bf16.msra.mxu0 %v2981_v23  ;;  %v1356_v30 = vpop.f32.mrf.mxu0 }
  0xec   :  { %1854 = vmatpush.bf16.msra.mxu1 %v2989_v25  ;;  %v1357_v31 = vadd.f32 %v1356_v30, %v1344_v27  ;;  %v1369_v32 = vpop.f32.mrf.mxu1 }
  0xed   :  { %1867 = vmatpush.bf16.msra.mxu2 %v2997_v50 }
  0xee   :  { %1842 = vmatmul.bf16.vlgmr.msra.gmra.mxu0 %v1570_v26  ;;  %v1370_v33 = vadd.f32 %v1369_v32, %v1357_v31  ;;  %1880 = vmatpush.bf16.msra.mxu3 %v3005_v22 }
  0xf3   :  { %v1382_v34 = vpop.f32.mrf.mxu2  ;;  %v1358_v42 = vpop.f32.mrf.mxu0 }
  0xf4   :  { %v1383_v37 = vadd.f32 %v1382_v34, %v1370_v33  ;;  %v1395_v39 = vpop.f32.mrf.mxu3  ;;  %v1371_v43 = vpop.f32.mrf.mxu1 }
  0xf6   :  { %v1396_v41 = vadd.f32 %v1395_v39, %v1383_v37 }
  0xf8   :  { %v1571_v44 = vpack.c.bf16 %v1396_v41, %v1396_v41 }
  0xfa   :  { %1855 = vmatmul.bf16.vlgmr.msra.gmra.mxu1 %v1571_v44 }
  0xfb   :  { %v1384_v45 = vpop.f32.mrf.mxu2 }
  0xfc   :  { %v1397_v46 = vpop.f32.mrf.mxu3 }
 0x10b   :  { %v1408_v48 = vpop.f32.mrf.mxu0 }
 0x10c   :  { %v1421_v49 = vpop.f32.mrf.mxu1 }
 0x10d   :  { %v1422_v60 = vadd.f32 %v1421_v49, %v1408_v48 }
 0x113   :  { %v1434_v52 = vpop.f32.mrf.mxu2  ;;  %v1410_v54 = vpop.f32.mrf.mxu0 }
 0x114   :  { %v1447_v55 = vpop.f32.mrf.mxu3  ;;  %v1423_v56 = vpop.f32.mrf.mxu1  ;;  %v1435_v20 = vadd.f32 %v1434_v52, %v1422_v60 }
 0x116   :  { %v1448_v62 = vadd.f32 %v1447_v55, %v1435_v20 }
 0x11b   :  { %v1436_v58 = vpop.f32.mrf.mxu2 }
 0x11c   :  { %v1449_v18 = vpop.f32.mrf.mxu3 }
 0x12b   :  { %v1460_v0 = vpop.f32.mrf.mxu0 }
 0x12c   :  { %v1461_v1 = vadd.f32 %v1460_v0, %v1448_v62  ;;  %v1473_v2 = vpop.f32.mrf.mxu1 }
 0x12e   :  { %v1474_v3 = vadd.f32 %v1473_v2, %v1461_v1 }
 0x130   :  { %v1572_v4 = vpack.c.bf16 %v1474_v3, %v1474_v3 }
 0x132   :  { %1868 = vmatmul.bf16.vlgmr.msra.gmra.mxu2 %v1572_v4 }
 0x133   :  { %v1486_v5 = vpop.f32.mrf.mxu2  ;;  %v1462_v6 = vpop.f32.mrf.mxu0 }
 0x134   :  { %v1499_v35 = vpop.f32.mrf.mxu3  ;;  %v1475_v38 = vpop.f32.mrf.mxu1 }
 0x135   :  { %v1500_v9 = vadd.f32 %v1499_v35, %v1486_v5 }
 0x13b   :  { %v1488_v7 = vpop.f32.mrf.mxu2 }
 0x13c   :  { %v1501_v8 = vpop.f32.mrf.mxu3 }
 0x14b   :  { %v1512_v10 = vpop.f32.mrf.mxu0 }
 0x14c   :  { %v1525_v11 = vpop.f32.mrf.mxu1  ;;  %v1513_v12 = vadd.f32 %v1512_v10, %v1500_v9 }
 0x14e   :  { %v1526_v13 = vadd.f32 %v1525_v11, %v1513_v12 }
 0x153   :  { %v1538_v14 = vpop.f32.mrf.mxu2  ;;  %v1514_v17 = vpop.f32.mrf.mxu0 }
 0x154   :  { %v1539_v15 = vadd.f32 %v1538_v14, %v1526_v13  ;;  %v1551_v16 = vpop.f32.mrf.mxu3  ;;  %v1527_v21 = vpop.f32.mrf.mxu1 }
 0x156   :  { %v1552_v23 = vadd.f32 %v1551_v16, %v1539_v15 }
 0x158   :  { %v1573_v24 = vpack.c.bf16 %v1552_v23, %v1552_v23 }
 0x15a   :  { %1881 = vmatmul.bf16.vlgmr.msra.gmra.mxu3 %v1573_v24 }
 0x15b   :  { %v1540_v25 = vpop.f32.mrf.mxu2 }
 0x15c   :  { %v1553_v26 = vpop.f32.mrf.mxu3 }
 0x16b   :  { %v1843_v27 = vpop.f32.mrf.mxu0 }
 0x16c   :  { %v1844_v30 = vadd.f32 %v3019_v29, %v1843_v27 }
 0x173   :  { %v1845_v28 = vpop.f32.mrf.mxu0 }
 0x177   :  { %v1856_v31 = vpop.f32.mrf.mxu1 }
 0x178   :  { %v1857_v32 = vadd.f32 %v1856_v31, %v1844_v30 }
 0x17f   :  { %v1858_v33 = vpop.f32.mrf.mxu1 }
 0x1b5   :  { %v1869_v34 = vpop.f32.mrf.mxu2 }
 0x1b6   :  { %v1870_v37 = vadd.f32 %v1869_v34, %v1857_v32 }
 0x1bd   :  { %v1871_v36 = vpop.f32.mrf.mxu2 }
 0x1dd   :  { %v1882_v39 = vpop.f32.mrf.mxu3 }
 0x1de   :  { %v1883_v40 = vadd.f32 %v1882_v39, %v1870_v37 }
 0x1e0   :  { %1886 = vst [vmem:[%s3170_s4] sm:$0xff] %v1883_v40 }
 0x1e5   :  { %v1884_v41 = vpop.f32.mrf.mxu3 }
 0x1e6   :  { %1891 = vsyncpa [#allocation4], 1 }
 0x1e7   :  { %1892 = vsyncpa [#allocation6], 1 }

</bundles_post_ra>
